<compile_context>
chip_gen: v6e
topology: v6e:2x2x1
jax: 0.10.0
libtpu: 0.0.40
codegen_flags: <defaults>
</compile_context>

<pallas_src>
import jax
import jax.numpy as jnp
from jax.experimental import pallas as pl
from jax.experimental.pallas import tpu as pltpu


def _round_up(a, b):
    return (a + b - 1) // b * b


def _hash_bits(seed_u32, salt, row_offset_u32, shape):
    """Stateless per-element random bits (murmur3 fmix32 finalizer) on the VPU."""
    rows = jax.lax.broadcasted_iota(jnp.int32, shape, 0).astype(jnp.uint32)
    cols = jax.lax.broadcasted_iota(jnp.int32, shape, 1).astype(jnp.uint32)
    rows = rows + row_offset_u32                       # global batch row index
    x = (rows * jnp.uint32(0x9E3779B1)
         + cols * jnp.uint32(0x85EBCA77)
         + seed_u32 * jnp.uint32(0x27D4EB2F)
         + jnp.uint32(salt))
    x = x ^ (x >> 16)
    x = x * jnp.uint32(0x85EBCA6B)
    x = x ^ (x >> 13)
    x = x * jnp.uint32(0xC2B2AE35)
    x = x ^ (x >> 16)
    return x


def mlp_kernel(seed_ref,                         # scalar-prefetch (SMEM), shape (1,)
               x_ref, w0_ref, b0_ref,
               w1_ref, b1_ref,
               w2_ref, b2_ref,
               o_ref):
    tm = x_ref.shape[0]
    seed = seed_ref[0].astype(jnp.uint32)
    row_off = (pl.program_id(0) * tm).astype(jnp.uint32)   # unique rows per tile

    def relu_dropout(h, salt):
        # Fused relu + dropout(p=0.5, training=True): keep iff h>0 and coin==heads,
        # survivors scaled by 1/(1-p) = 2.
        bits = _hash_bits(seed, salt, row_off, h.shape)
        keep = (bits & jnp.uint32(0x80000000)) == jnp.uint32(0)
        return jnp.where(keep & (h > 0.0), h * 2.0, 0.0)

    x = x_ref[...]                                   # bf16 tile

    # fc -> relu -> dropout
    h = jnp.dot(x, w0_ref[...], preferred_element_type=jnp.float32) + b0_ref[...]
    h = relu_dropout(h, 1)

    # fc1 -> relu -> dropout
    h = jnp.dot(h.astype(jnp.bfloat16), w1_ref[...],
                preferred_element_type=jnp.float32) + b1_ref[...]
    h = relu_dropout(h, 2)

    # fc2 -> sigmoid (lane-dense padded output slab)
    z = jnp.dot(h.astype(jnp.bfloat16), w2_ref[...],
                preferred_element_type=jnp.float32) + b2_ref[...]
    o_ref[...] = jax.nn.sigmoid(z).astype(o_ref.dtype)


def mlp_classifier_forward(x, params, seed, *, block_rows=128):
    """x: (N, H) float32.  params: (in,out) weights (== PyTorch weight.T), (1,out) biases.
    Returns (N, O) float32 sigmoid probabilities (dropout in training mode, p=0.5)."""
    N, H = x.shape
    O = params["w2"].shape[1]

    # Lane-dense output: pad O up to a multiple of 128 (zero weight/bias columns).
    OP = _round_up(O, 128)
    w2p = jnp.pad(params["w2"], ((0, 0), (0, OP - O)))
    b2p = jnp.pad(params["b2"], ((0, 0), (0, OP - O)))

    # bf16 MXU operands; biases / accumulation / element-wise stay f32.
    x_bf = x.astype(jnp.bfloat16)
    w0 = params["w0"].astype(jnp.bfloat16)
    w1 = params["w1"].astype(jnp.bfloat16)
    w2 = w2p.astype(jnp.bfloat16)
    b0 = params["b0"].astype(jnp.float32)
    b1 = params["b1"].astype(jnp.float32)
    b2 = b2p.astype(jnp.float32)

    # Batch tiling: pad N up to a multiple of TM so every block is full, then slice.
    TM = min(block_rows, _round_up(N, 8))
    NP = _round_up(N, TM)
    if NP != N:
        x_bf = jnp.pad(x_bf, ((0, NP - N), (0, 0)))
    grid = (NP // TM,)

    seed_arr = jnp.asarray(seed, dtype=jnp.int32).reshape((1,))

    grid_spec = pltpu.PrefetchScalarGridSpec(
        num_scalar_prefetch=1,                       # seed lands in SMEM
        grid=grid,
        in_specs=[
            pl.BlockSpec((TM, H), lambda i, s: (i, 0)),    # x tile (pipelined)
            pl.BlockSpec((H, H), lambda i, s: (0, 0)),     # w0 (VMEM-resident)
            pl.BlockSpec((1, H), lambda i, s: (0, 0)),     # b0
            pl.BlockSpec((H, H), lambda i, s: (0, 0)),     # w1
            pl.BlockSpec((1, H), lambda i, s: (0, 0)),     # b1
            pl.BlockSpec((H, OP), lambda i, s: (0, 0)),    # w2 (padded, resident)
            pl.BlockSpec((1, OP), lambda i, s: (0, 0)),    # b2 (padded)
        ],
        out_specs=pl.BlockSpec((TM, OP), lambda i, s: (i, 0)),
    )

    out = pl.pallas_call(
        mlp_kernel,
        out_shape=jax.ShapeDtypeStruct((NP, OP), jnp.float32),
        grid_spec=grid_spec,
        compiler_params=pltpu.CompilerParams(
            dimension_semantics=("parallel",)),      # shards batch tiles across TCs (v7x)
    )(seed_arr, x_bf, w0, b0, w1, b1, w2, b2)

    return out[:N, :O]


def init_params(key, hidden_channels, out_channels):
    """Deterministic init mimicking nn.Linear defaults (uniform +/- 1/sqrt(fan_in)).
    Weights stored transposed relative to PyTorch: (in_features, out_features)."""
    k = jax.random.split(key, 6)
    bound_h = 1.0 / jnp.sqrt(hidden_channels)

    def u(kk, shape, bound):
        return jax.random.uniform(kk, shape, jnp.float32, -bound, bound)

    return {
        "w0": u(k[0], (hidden_channels, hidden_channels), bound_h),
        "b0": u(k[1], (1, hidden_channels), bound_h),
        "w1": u(k[2], (hidden_channels, hidden_channels), bound_h),
        "b1": u(k[3], (1, hidden_channels), bound_h),
        "w2": u(k[4], (hidden_channels, out_channels), bound_h),
        "b2": u(k[5], (1, out_channels), bound_h),
    }


if __name__ == "__main__":
    N = 256            # batch (2 grid tiles of 128 rows)
    HIDDEN = 128       # hidden_channels (lane-dense)
    OUT = 8            # out_channels (padded to 128 lanes in-kernel, sliced back)

    key = jax.random.PRNGKey(0)
    kx, kp = jax.random.split(key)

    x = jax.random.normal(kx, (N, HIDDEN), jnp.float32)
    params = init_params(kp, HIDDEN, OUT)
    seed = 1234

    out = mlp_classifier_forward(x, params, seed)
    out = jax.block_until_ready(out)

    assert out.shape == (N, OUT)
    assert bool(jnp.all(jnp.isfinite(out)))
    assert bool(jnp.all((out >= 0.0) & (out <= 1.0)))
    print("KERNEL_OK")
</pallas_src>

<mosaic_0001>
module attributes {stable_mosaic.version = 11 : i64} {
  func.func @mlp_kernel(%arg0: i32, %arg1: memref<1xi32, #tpu.memory_space<smem>>, %arg2: memref<128x128xbf16, #tpu.memory_space<vmem>>, %arg3: memref<128x128xbf16, #tpu.memory_space<vmem>>, %arg4: memref<1x128xf32, #tpu.memory_space<vmem>>, %arg5: memref<128x128xbf16, #tpu.memory_space<vmem>>, %arg6: memref<1x128xf32, #tpu.memory_space<vmem>>, %arg7: memref<128x128xbf16, #tpu.memory_space<vmem>>, %arg8: memref<1x128xf32, #tpu.memory_space<vmem>>, %arg9: memref<128x128xf32, #tpu.memory_space<vmem>>) attributes {dimension_semantics = [#tpu.dimension_semantics<parallel>], iteration_bounds = array<i64: 2>, scalar_prefetch = 1 : i64, scratch_operands = 0 : i64, tpu.core_type = #tpu.core_type<tc>, window_params = [{transform_indices = @transform_0, window_bounds = array<i64: 128, 128>}, {pipeline_mode = #tpu.pipeline_mode<synchronous>, transform_indices = @transform_1, window_bounds = array<i64: 128, 128>}, {pipeline_mode = #tpu.pipeline_mode<synchronous>, transform_indices = @transform_2, window_bounds = array<i64: 1, 128>}, {pipeline_mode = #tpu.pipeline_mode<synchronous>, transform_indices = @transform_3, window_bounds = array<i64: 128, 128>}, {pipeline_mode = #tpu.pipeline_mode<synchronous>, transform_indices = @transform_4, window_bounds = array<i64: 1, 128>}, {pipeline_mode = #tpu.pipeline_mode<synchronous>, transform_indices = @transform_5, window_bounds = array<i64: 128, 128>}, {pipeline_mode = #tpu.pipeline_mode<synchronous>, transform_indices = @transform_6, window_bounds = array<i64: 1, 128>}, {transform_indices = @transform_7, window_bounds = array<i64: 128, 128>}]} {
    %c0 = arith.constant 0 : index
    %0 = memref.load %arg1[%c0] : memref<1xi32, #tpu.memory_space<smem>>
    %c128_i32 = arith.constant 128 : i32
    %1 = arith.muli %arg0, %c128_i32 : i32
    %c0_0 = arith.constant 0 : index
    %c0_1 = arith.constant 0 : index
    %2 = vector.load %arg2[%c0_0, %c0_1] : memref<128x128xbf16, #tpu.memory_space<vmem>>, vector<128x128xbf16>
    %c0_2 = arith.constant 0 : index
    %c0_3 = arith.constant 0 : index
    %3 = vector.load %arg3[%c0_2, %c0_3] : memref<128x128xbf16, #tpu.memory_space<vmem>>, vector<128x128xbf16>
    %cst = arith.constant dense<0.000000e+00> : vector<128x128xf32>
    %4 = tpu.matmul %2, %3, %cst {dimension_numbers = #tpu.dot_dimension_numbers<[1], [0], [0], [1], [0, 0, 1, 1], [], []>} : vector<128x128xbf16>, vector<128x128xbf16>, vector<128x128xf32> -> vector<128x128xf32>
    %c0_4 = arith.constant 0 : index
    %c0_5 = arith.constant 0 : index
    %5 = vector.load %arg4[%c0_4, %c0_5] : memref<1x128xf32, #tpu.memory_space<vmem>>, vector<1x128xf32>
    %6 = vector.broadcast %5 : vector<1x128xf32> to vector<128x128xf32>
    %7 = arith.addf %4, %6 : vector<128x128xf32>
    %8 = tpu.iota {dimensions = array<i32: 0>} : vector<128x128xi32>
    %9 = tpu.iota {dimensions = array<i32: 1>} : vector<128x128xi32>
    %10 = vector.broadcast %1 : i32 to vector<128x128xi32>
    %11 = arith.addi %8, %10 : vector<128x128xi32>
    %c-1640531535_i32 = arith.constant -1640531535 : i32
    %12 = vector.broadcast %c-1640531535_i32 : i32 to vector<128x128xi32>
    %13 = arith.muli %11, %12 : vector<128x128xi32>
    %c-2048144777_i32 = arith.constant -2048144777 : i32
    %14 = vector.broadcast %c-2048144777_i32 : i32 to vector<128x128xi32>
    %15 = arith.muli %9, %14 : vector<128x128xi32>
    %16 = arith.addi %13, %15 : vector<128x128xi32>
    %c668265263_i32 = arith.constant 668265263 : i32
    %17 = arith.muli %0, %c668265263_i32 : i32
    %18 = vector.broadcast %17 : i32 to vector<128x128xi32>
    %19 = arith.addi %16, %18 : vector<128x128xi32>
    %c1_i32 = arith.constant 1 : i32
    %20 = vector.broadcast %c1_i32 : i32 to vector<128x128xi32>
    %21 = arith.addi %19, %20 : vector<128x128xi32>
    %c16_i32 = arith.constant 16 : i32
    %22 = vector.broadcast %c16_i32 : i32 to vector<128x128xi32>
    %23 = arith.shrui %21, %22 : vector<128x128xi32>
    %24 = arith.xori %21, %23 : vector<128x128xi32>
    %c-2048144789_i32 = arith.constant -2048144789 : i32
    %25 = vector.broadcast %c-2048144789_i32 : i32 to vector<128x128xi32>
    %26 = arith.muli %24, %25 : vector<128x128xi32>
    %c13_i32 = arith.constant 13 : i32
    %27 = vector.broadcast %c13_i32 : i32 to vector<128x128xi32>
    %28 = arith.shrui %26, %27 : vector<128x128xi32>
    %29 = arith.xori %26, %28 : vector<128x128xi32>
    %c-1028477387_i32 = arith.constant -1028477387 : i32
    %30 = vector.broadcast %c-1028477387_i32 : i32 to vector<128x128xi32>
    %31 = arith.muli %29, %30 : vector<128x128xi32>
    %c16_i32_6 = arith.constant 16 : i32
    %32 = vector.broadcast %c16_i32_6 : i32 to vector<128x128xi32>
    %33 = arith.shrui %31, %32 : vector<128x128xi32>
    %34 = arith.xori %31, %33 : vector<128x128xi32>
    %c-2147483648_i32 = arith.constant -2147483648 : i32
    %35 = vector.broadcast %c-2147483648_i32 : i32 to vector<128x128xi32>
    %36 = arith.andi %34, %35 : vector<128x128xi32>
    %c0_i32 = arith.constant 0 : i32
    %37 = vector.broadcast %c0_i32 : i32 to vector<128x128xi32>
    %38 = arith.cmpi eq, %36, %37 : vector<128x128xi32>
    %cst_7 = arith.constant 0.000000e+00 : f32
    %39 = vector.broadcast %cst_7 : f32 to vector<128x128xf32>
    %40 = arith.cmpf ogt, %7, %39 : vector<128x128xf32>
    %41 = arith.andi %38, %40 : vector<128x128xi1>
    %cst_8 = arith.constant 2.000000e+00 : f32
    %42 = vector.broadcast %cst_8 : f32 to vector<128x128xf32>
    %43 = arith.mulf %7, %42 : vector<128x128xf32>
    %cst_9 = arith.constant 0.000000e+00 : f32
    %44 = vector.broadcast %cst_9 : f32 to vector<128x128xf32>
    %45 = arith.select %41, %43, %44 : vector<128x128xi1>, vector<128x128xf32>
    %46 = arith.truncf %45 : vector<128x128xf32> to vector<128x128xbf16>
    %c0_10 = arith.constant 0 : index
    %c0_11 = arith.constant 0 : index
    %47 = vector.load %arg5[%c0_10, %c0_11] : memref<128x128xbf16, #tpu.memory_space<vmem>>, vector<128x128xbf16>
    %cst_12 = arith.constant dense<0.000000e+00> : vector<128x128xf32>
    %48 = tpu.matmul %46, %47, %cst_12 {dimension_numbers = #tpu.dot_dimension_numbers<[1], [0], [0], [1], [0, 0, 1, 1], [], []>} : vector<128x128xbf16>, vector<128x128xbf16>, vector<128x128xf32> -> vector<128x128xf32>
    %c0_13 = arith.constant 0 : index
    %c0_14 = arith.constant 0 : index
    %49 = vector.load %arg6[%c0_13, %c0_14] : memref<1x128xf32, #tpu.memory_space<vmem>>, vector<1x128xf32>
    %50 = vector.broadcast %49 : vector<1x128xf32> to vector<128x128xf32>
    %51 = arith.addf %48, %50 : vector<128x128xf32>
    %52 = tpu.iota {dimensions = array<i32: 0>} : vector<128x128xi32>
    %53 = tpu.iota {dimensions = array<i32: 1>} : vector<128x128xi32>
    %54 = vector.broadcast %1 : i32 to vector<128x128xi32>
    %55 = arith.addi %52, %54 : vector<128x128xi32>
    %c-1640531535_i32_15 = arith.constant -1640531535 : i32
    %56 = vector.broadcast %c-1640531535_i32_15 : i32 to vector<128x128xi32>
    %57 = arith.muli %55, %56 : vector<128x128xi32>
    %c-2048144777_i32_16 = arith.constant -2048144777 : i32
    %58 = vector.broadcast %c-2048144777_i32_16 : i32 to vector<128x128xi32>
    %59 = arith.muli %53, %58 : vector<128x128xi32>
    %60 = arith.addi %57, %59 : vector<128x128xi32>
    %c668265263_i32_17 = arith.constant 668265263 : i32
    %61 = arith.muli %0, %c668265263_i32_17 : i32
    %62 = vector.broadcast %61 : i32 to vector<128x128xi32>
    %63 = arith.addi %60, %62 : vector<128x128xi32>
    %c2_i32 = arith.constant 2 : i32
    %64 = vector.broadcast %c2_i32 : i32 to vector<128x128xi32>
    %65 = arith.addi %63, %64 : vector<128x128xi32>
    %c16_i32_18 = arith.constant 16 : i32
    %66 = vector.broadcast %c16_i32_18 : i32 to vector<128x128xi32>
    %67 = arith.shrui %65, %66 : vector<128x128xi32>
    %68 = arith.xori %65, %67 : vector<128x128xi32>
    %c-2048144789_i32_19 = arith.constant -2048144789 : i32
    %69 = vector.broadcast %c-2048144789_i32_19 : i32 to vector<128x128xi32>
    %70 = arith.muli %68, %69 : vector<128x128xi32>
    %c13_i32_20 = arith.constant 13 : i32
    %71 = vector.broadcast %c13_i32_20 : i32 to vector<128x128xi32>
    %72 = arith.shrui %70, %71 : vector<128x128xi32>
    %73 = arith.xori %70, %72 : vector<128x128xi32>
    %c-1028477387_i32_21 = arith.constant -1028477387 : i32
    %74 = vector.broadcast %c-1028477387_i32_21 : i32 to vector<128x128xi32>
    %75 = arith.muli %73, %74 : vector<128x128xi32>
    %c16_i32_22 = arith.constant 16 : i32
    %76 = vector.broadcast %c16_i32_22 : i32 to vector<128x128xi32>
    %77 = arith.shrui %75, %76 : vector<128x128xi32>
    %78 = arith.xori %75, %77 : vector<128x128xi32>
    %c-2147483648_i32_23 = arith.constant -2147483648 : i32
    %79 = vector.broadcast %c-2147483648_i32_23 : i32 to vector<128x128xi32>
    %80 = arith.andi %78, %79 : vector<128x128xi32>
    %c0_i32_24 = arith.constant 0 : i32
    %81 = vector.broadcast %c0_i32_24 : i32 to vector<128x128xi32>
    %82 = arith.cmpi eq, %80, %81 : vector<128x128xi32>
    %cst_25 = arith.constant 0.000000e+00 : f32
    %83 = vector.broadcast %cst_25 : f32 to vector<128x128xf32>
    %84 = arith.cmpf ogt, %51, %83 : vector<128x128xf32>
    %85 = arith.andi %82, %84 : vector<128x128xi1>
    %cst_26 = arith.constant 2.000000e+00 : f32
    %86 = vector.broadcast %cst_26 : f32 to vector<128x128xf32>
    %87 = arith.mulf %51, %86 : vector<128x128xf32>
    %cst_27 = arith.constant 0.000000e+00 : f32
    %88 = vector.broadcast %cst_27 : f32 to vector<128x128xf32>
    %89 = arith.select %85, %87, %88 : vector<128x128xi1>, vector<128x128xf32>
    %90 = arith.truncf %89 : vector<128x128xf32> to vector<128x128xbf16>
    %c0_28 = arith.constant 0 : index
    %c0_29 = arith.constant 0 : index
    %91 = vector.load %arg7[%c0_28, %c0_29] : memref<128x128xbf16, #tpu.memory_space<vmem>>, vector<128x128xbf16>
    %cst_30 = arith.constant dense<0.000000e+00> : vector<128x128xf32>
    %92 = tpu.matmul %90, %91, %cst_30 {dimension_numbers = #tpu.dot_dimension_numbers<[1], [0], [0], [1], [0, 0, 1, 1], [], []>} : vector<128x128xbf16>, vector<128x128xbf16>, vector<128x128xf32> -> vector<128x128xf32>
    %c0_31 = arith.constant 0 : index
    %c0_32 = arith.constant 0 : index
    %93 = vector.load %arg8[%c0_31, %c0_32] : memref<1x128xf32, #tpu.memory_space<vmem>>, vector<1x128xf32>
    %94 = vector.broadcast %93 : vector<1x128xf32> to vector<128x128xf32>
    %95 = arith.addf %92, %94 : vector<128x128xf32>
    %96 = arith.negf %95 : vector<128x128xf32>
    %97 = math.exp %96 : vector<128x128xf32>
    %cst_33 = arith.constant 1.000000e+00 : f32
    %98 = vector.broadcast %cst_33 : f32 to vector<128x128xf32>
    %99 = arith.addf %98, %97 : vector<128x128xf32>
    %100 = arith.divf %98, %99 : vector<128x128xf32>
    %c0_34 = arith.constant 0 : index
    %c0_35 = arith.constant 0 : index
    %101 = vector.load %arg9[%c0_34, %c0_35] : memref<128x128xf32, #tpu.memory_space<vmem>>, vector<128x128xf32>
    tpu.vector_store %arg9[%c0_34, %c0_35], %100 {strides = array<i32>} : memref<128x128xf32, #tpu.memory_space<vmem>>, vector<128x128xf32>,
    return
  }
  func.func @transform_0(%arg0: i32, %arg1: memref<1xi32, #tpu.memory_space<smem>>) -> (i32, i32) {
    %c0_i32 = arith.constant 0 : i32
    %c0_i32_0 = arith.constant 0 : i32
    return %arg0, %c0_i32 : i32, i32
  }
  func.func @transform_1(%arg0: i32, %arg1: memref<1xi32, #tpu.memory_space<smem>>) -> (i32, i32) {
    %c0_i32 = arith.constant 0 : i32
    %c0_i32_0 = arith.constant 0 : i32
    %c0_i32_1 = arith.constant 0 : i32
    return %c0_i32, %c0_i32_0 : i32, i32
  }
  func.func @transform_2(%arg0: i32, %arg1: memref<1xi32, #tpu.memory_space<smem>>) -> (i32, i32) {
    %c0_i32 = arith.constant 0 : i32
    %c0_i32_0 = arith.constant 0 : i32
    %c0_i32_1 = arith.constant 0 : i32
    return %c0_i32, %c0_i32_0 : i32, i32
  }
  func.func @transform_3(%arg0: i32, %arg1: memref<1xi32, #tpu.memory_space<smem>>) -> (i32, i32) {
    %c0_i32 = arith.constant 0 : i32
    %c0_i32_0 = arith.constant 0 : i32
    %c0_i32_1 = arith.constant 0 : i32
    return %c0_i32, %c0_i32_0 : i32, i32
  }
  func.func @transform_4(%arg0: i32, %arg1: memref<1xi32, #tpu.memory_space<smem>>) -> (i32, i32) {
    %c0_i32 = arith.constant 0 : i32
    %c0_i32_0 = arith.constant 0 : i32
    %c0_i32_1 = arith.constant 0 : i32
    return %c0_i32, %c0_i32_0 : i32, i32
  }
  func.func @transform_5(%arg0: i32, %arg1: memref<1xi32, #tpu.memory_space<smem>>) -> (i32, i32) {
    %c0_i32 = arith.constant 0 : i32
    %c0_i32_0 = arith.constant 0 : i32
    %c0_i32_1 = arith.constant 0 : i32
    return %c0_i32, %c0_i32_0 : i32, i32
  }
  func.func @transform_6(%arg0: i32, %arg1: memref<1xi32, #tpu.memory_space<smem>>) -> (i32, i32) {
    %c0_i32 = arith.constant 0 : i32
    %c0_i32_0 = arith.constant 0 : i32
    %c0_i32_1 = arith.constant 0 : i32
    return %c0_i32, %c0_i32_0 : i32, i32
  }
  func.func @transform_7(%arg0: i32, %arg1: memref<1xi32, #tpu.memory_space<smem>>) -> (i32, i32) {
    %c0_i32 = arith.constant 0 : i32
    %c0_i32_0 = arith.constant 0 : i32
    return %arg0, %c0_i32 : i32, i32
  }
}

</mosaic_0001>

<bundles_post_ra>
// kernel: tpu_custom_call.1
= control target key start
LH: loop header
LB: loop body
LE: loop exit
PB: predicated region body
PF: predicated region fallthrough
CT: control target
= control target key end

     0   :  { %s3218_s0 = inlined_call_operand.<no memory space> [shape: s32[1], index: 0, kind: input, shape index: {}]   ;;  %s3219_s1 = inlined_call_operand.hbm [shape: bf16[256,128], index: 1, kind: input, shape index: {}]   ;;  %s3220_s2 = inlined_call_operand.hbm [shape: bf16[128,128], index: 2, kind: input, shape index: {}]   ;;  %s3221_s3 = inlined_call_operand.vmem [shape: f32[1,128], index: 3, kind: input, shape index: {}]   ;;  %s3222_s4 = inlined_call_operand.hbm [shape: bf16[128,128], index: 4, kind: input, shape index: {}]   ;;  %s3223_s5 = inlined_call_operand.vmem [shape: f32[1,128], index: 5, kind: input, shape index: {}]   ;;  %s3224_s6 = inlined_call_operand.hbm [shape: bf16[128,128], index: 6, kind: input, shape index: {}]   ;;  %s3225_s7 = inlined_call_operand.vmem [shape: f32[1,128], index: 7, kind: input, shape index: {}]   ;;  %s3226_s8 = inlined_call_operand.hbm [shape: f32[256,128], index: 8, kind: output, shape index: {}]  }
   0x1   :  { %3233 = sst [smem:[#allocation17_spill]] %s3220_s2 }
   0x2   :  { %13 = sst [smem:[#allocation3]] %s3218_s0 }
   0x3   :  { %14 = vsyncpa [#allocation5], 0 }
   0x4   :  { %16 = vsyncpa [#allocation5 + $0x1], 0 }
   0x5   :  { %17 = vsyncpa [#allocation8], 0 }
   0x6   :  { %18 = vsyncpa [#allocation11], 0 }
   0x7   :  { %19 = vsyncpa [#allocation6], 0 }
   0x8   :  { %21 = vsyncpa [#allocation6 + $0x1], 0  ;;  %s2423_s29 = smov 0   ;;  %s2425_s30 = smov 0  }
   0x9   :  { %s2427_s9 = smov 0   ;;  %s2429_s10 = smov 0  }
   0xa LB: > { %s2444_s0 = sadd.s32 4294967295, %s2364_s10   ;;  %s1727_s11 = sadd.s32 4294967294, %s2364_s10   ;;  %s2364_s10 = sphi %s2429_s10, %s3337_s10   ;;  %s2360_s9 = sphi %s2427_s9, %s3336_s9   ;;  %s2356_s30 = sphi %s2425_s30, %s3335_s30   ;;  %s2352_s29 = sphi %s2423_s29, %s3334_s29  }
   0xb   : > { %p47_p0 = scmp.ne.s32.totalorder %s2356_s30, %s2352_s29  ;;  %p3227_p1 = scmp.eq.s32.totalorder %s2444_s0, 0 }
   0xc   : > { %p197_p2 = scmp.eq.s32.totalorder %s2444_s0, 1  ;;  %p203_p3 = scmp.eq.s32.totalorder %s1727_s11, 1 }
   0xd   : > { %p2453_p4 = por %p3227_p1, %p47_p0  ;;  %p1728_p5 = scmp.ge.s32.totalorder %s2364_s10, 1 }
   0xe   : > { %p2458_p6 = por %p203_p3, %p47_p0  ;;  %p210_p7 = scmp.lt.s32.totalorder %s2364_s10, 3 }
   0xf   : > { %s3234_s12 = scalar_select %p2453_p4, 1, 0 }
  0x10   : > { %s3235_s13 = scalar_select %p2458_p6, 1, 0 }
  0x11   : > { %p2463_p8 = pnand %p1728_p5, %p210_p7  ;;  %s2366_s15 = smov [#allocation7]  }
  0x12   : > { %s222_s16 = sshll.u32 %s2366_s15, 4  ;;  %s2367_s18 = smov [#allocation9]   ;;  %s223_s16 = int_to_ptr.vmem [resolvable:$true] %s222_s16 }
  0x13   : > { %s3236_s14 = scalar_select %p2463_p8, 1, 0 }
  0x14   : > { %p2025_p9 = pneg %p2463_p8  ;;  %s238_s19 = sshll.u32 %s2367_s18, 4  ;;  %s239_s19 = int_to_ptr.vmem [resolvable:$true] %s238_s19 }
  0x15   : > { %s2368_s20 = smov [#allocation10]   ;;  %s2197_s22 = scalar_lea.vmem %s223_s16, 1024 }
  0x16   : > { %p2472_p11 = pnand %p2025_p9, %p3227_p1  ;;  %s254_s21 = sshll.u32 %s2368_s20, 4  ;;  %s255_s21 = int_to_ptr.vmem [resolvable:$true] %s254_s21 }
  0x17   : > { %p2198_p13 = scmp.ne.s32.totalorder %s223_s16, %s2197_s22  ;;  %p2205_p5 = scmp.lt.s32.totalorder %s223_s16, %s223_s16 }
  0x18   : > { %p2188_p12 = pneg %p2472_p11  ;;  %p2206_p7 = scmp.lt.s32.totalorder %s2197_s22, %s2197_s22 }
  0x1a   : > { %p2200_p0 = pnand %p2198_p13, %p2188_p12  ;;  %p2207_p9 = por %p2206_p7, %p2205_p5 }
  0x1c   : > { %p2201_p3 = pneg %p2200_p0 }
  0x1e   : > { %p2208_p10 = pnand %p2207_p9, %p2201_p3 }
  0x20   : > { %2211 = shalt.err (!%p2208_p10)
}
  0x21   : > { %s3228_s23 = smov 64   ;;  %s3229_s24 = smov 4  }
  0x22   : > { %s3238_s2 = sld [smem:[#allocation17_spill]]  ;;  %s2223_s27 = scalar_lea.vmem %s239_s19, 1024 }
  0x23   : > { %p2224_p13 = scmp.ne.s32.totalorder %s239_s19, %s2223_s27  ;;  %p2231_p3 = scmp.lt.s32.totalorder %s239_s19, %s239_s19 }
  0x24   : > { %p2232_p10 = scmp.lt.s32.totalorder %s2223_s27, %s2223_s27 }
  0x25   : > { %p2226_p0 = pnand %p2224_p13, %p2188_p12 }
  0x26   : > { %p2233_p7 = por %p2232_p10, %p2231_p3 }
  0x27   : > { %p2227_p5 = pneg %p2226_p0 }
  0x28   : > { %2028 = dma.hbm_to_vmem [thread:$0]  (!%p2472_p11), %s3238_s2, 1024, %s223_s16, [#allocation8], %s3228_s23, %s3228_s23, %s3229_s24  }
  0x29   : > { %p2234_p9 = pnand %p2233_p7, %p2227_p5 }
  0x2b   : > { %2237 = shalt.err (!%p2234_p9)
}
  0x2c   : > { %2031 = dma.hbm_to_vmem [thread:$0]  (!%p2472_p11), %s3222_s4, 1024, %s239_s19, [#allocation8], %s3228_s23, %s3228_s23, %s3229_s24  }
  0x2d   : > { %s2249_s15 = scalar_lea.vmem %s255_s21, 1024  ;;  %p2257_p3 = scmp.lt.s32.totalorder %s255_s21, %s255_s21 }
  0x2e   : > { %p2250_p1 = scmp.ne.s32.totalorder %s255_s21, %s2249_s15  ;;  %p2258_p5 = scmp.lt.s32.totalorder %s2249_s15, %s2249_s15 }
  0x30   : > { %p2252_p13 = pnand %p2250_p1, %p2188_p12  ;;  %p2259_p10 = por %p2258_p5, %p2257_p3 }
  0x32   : > { %p2253_p0 = pneg %p2252_p13 }
  0x34   : > { %p2260_p7 = pnand %p2259_p10, %p2253_p0 }
  0x36   : > { %2263 = shalt.err (!%p2260_p7)
}
  0x37   : > { %2034 = dma.hbm_to_vmem [thread:$0]  (!%p2472_p11), %s3224_s6, 1024, %s255_s21, [#allocation11], %s3228_s23, %s3228_s23, %s3229_s24  }
  0x38   : > { %s2512_s19 = sadd.s32 1, %s2364_s10   ;;  %s34_s20 = sadd.s32 1, %s2360_s9 }
  0x39   : > { %s31_s17 = ssub.s32 %s2364_s10, %s2512_s19  ;;  %p41_p12 = scmp.ne.s32.totalorder %s2360_s9, %s2356_s30 }
  0x3a   : > { %p32_p1 = scmp.eq.s32.totalorder %s31_s17, 0  ;;  %p42_p9 = scmp.eq.s32.totalorder %s2364_s10, 0 }
  0x3b   : > { %p2046_p13 = scmp.lt.s32.totalorder %s2364_s10, 2  ;;  %p2526_p3 = por %p197_p2, %p41_p12 }
  0x3c   : > { %s2522_s22 = scalar_select %p32_p1, %s2360_s9, %s34_s20  }
  0x3d   : > { %p43_p0 = por %p42_p9, %p41_p12  ;;  %s271_s26 = sand.u32 1, %s2360_s9  }
  0x3e   : > { %s3239_s25 = scalar_select %p2526_p3, 1, 0 }
  0x3f   : > { %s1847_s27 = sshll.u32 %s2364_s10, 10  ;;  %s1733_s21 = sshll.u32 %s271_s26, 6 }
  0x40   : > { %s2535_s15 = scalar_lea.hbm %s3219_s1, %s1847_s27  ;;  %s275_s16 = scalar_lea.vmem [#allocation4], %s1733_s21 }
  0x41   : > { %s282_s18 = sshll.u32 %s275_s16, 4  ;;  %p2537_p11 = pnand %p2046_p13, %p43_p0  ;;  %s2541_s18 = int_to_ptr.vmem [resolvable:$true] %s282_s18 }
  0x42   : > { %s2543_s20 = scalar_lea.sflag [#allocation5], %s271_s26  ;;  %s2264_s23 = scalar_lea.hbm %s2535_s15, 1024 }
  0x43   : > { %p2265_p2 = scmp.ne.s32.totalorder %s2535_s15, %s2264_s23  ;;  %p2266_p5 = pneg %p2537_p11 }
  0x44   : > { %s2269_s21 = scalar_lea.hbm %s3219_s1, 2048  ;;  %p2270_p1 = scmp.lt.s32.totalorder %s2535_s15, %s3219_s1 }
  0x45   : > { %p2267_p10 = pnand %p2266_p5, %p2265_p2  ;;  %p2271_p12 = scmp.lt.s32.totalorder %s2269_s21, %s2264_s23 }
  0x47   : > { %p2268_p7 = pneg %p2267_p10  ;;  %p2272_p9 = por %p2271_p12, %p2270_p1 }
  0x49   : > { %p2273_p13 = pnand %p2272_p9, %p2268_p7 }
  0x4b   : > { %2276 = shalt.err (!%p2273_p13)
}
  0x4c   : > { %s2277_s26 = scalar_lea.vmem %s2541_s18, 1024  ;;  %s2371_s24 = smov [#allocation4]  }
  0x4d   : > { %p2278_p0 = scmp.ne.s32.totalorder %s2541_s18, %s2277_s26  ;;  %s2282_s2 = sshll.u32 %s2371_s24, 4  ;;  %s2283_s2 = int_to_ptr.vmem [resolvable:$false] %s2282_s2 }
  0x4e   : > { %s2284_s27 = scalar_lea.vmem %s2283_s2, 2048  ;;  %p2285_p10 = scmp.lt.s32.totalorder %s2541_s18, %s2283_s2 }
  0x4f   : > { %p2280_p6 = pnand %p2278_p0, %p2266_p5  ;;  %p2286_p3 = scmp.lt.s32.totalorder %s2284_s27, %s2277_s26 }
  0x51   : > { %p2281_p2 = pneg %p2280_p6  ;;  %p2287_p4 = por %p2286_p3, %p2285_p10 }
  0x53   : > { %p2288_p8 = pnand %p2287_p4, %p2281_p2 }
  0x55   : > { %2291 = shalt.err (!%p2288_p8)
}
  0x56   : > { %s3241_s23 = smov 4   ;;  %s3242_s28 = smov 64  }
  0x57   : > { %2038 = dma.hbm_to_vmem [thread:$0]  (!%p2537_p11), %s2535_s15, 1024, %s2541_s18, %s2543_s20, %s3242_s28, %s3242_s28, %s3241_s23  }
  0x58   : > { %p3243_p6 = scmp.ne.s32.totalorder %s3236_s14, 0 }
  0x59   : > { %s2570_s24 = sand.u32 (!%p3243_p6), 1, %s2356_s30   ;;  %p3244_p4 = scmp.ne.s32.totalorder (!%p3243_p6), %s3234_s12, 0 }
  0x5a   : > { %294 = sbr.rel (%p3243_p6) target bundleno = 820 (0x334), region = 48  ;;  %s1737_s2 = sshll.u32 (!%p3243_p6), %s2570_s24, 6 }
  0x5b   : > { %s297_s21 = scalar_lea.sflag (!%p3243_p6), [#allocation5], %s2570_s24  ;;  %s2574_s11 = scalar_lea.vmem (!%p3243_p6), [#allocation4], %s1737_s2 }
  0x5f   : > { %2335 = dma.done.wait (%p3244_p4), %s297_s21, 1024  }
  0x60   : > { %2337 = vsyncadd (%p3244_p4), %s297_s21, 4294966272  ;;  %p3245_p8 = scmp.eq.s32.totalorder %s2444_s0, 0 }
  0x62   : > { %2339 = dma.done.wait (%p3245_p8), [#allocation8], 2048   ;;  %p3246_p3 = pmov %p3245_p8 }
  0x64   : > { %2341 = vsyncadd (%p3246_p3), [#allocation8], 4294965248  ;;  %p3247_p11 = pmov %p3246_p3 }
  0x65   : > { %p3248_p5 = pmov %p3246_p3 }
  0x66   : > { %2343 = dma.done.wait (%p3247_p11), [#allocation11], 1024  }
  0x67   : > { %2345 = vsyncadd (%p3248_p5), [#allocation11], 4294966272  ;;  %v2090_v0 = vld [vmem:[#allocation7 + $0x38] sm:$0xff]   ;;  %v2091_v1 = vld [vmem:[#allocation7 + $0x30] sm:$0xff]   ;;  %v580_v29 = vlaneseq  ;;  %s1742_s12 = sshll.u32 %s2444_s0, 7  ;;  %s346_s14 = sld [smem:[#allocation3]] }
  0x68   : > { %1897 = vmatprep.subr.bf16.mxu0 %v2090_v0  ;;  %v2092_v2 = vld [vmem:[#allocation7 + $0x28] sm:$0xff]   ;;  %v2093_v3 = vld [vmem:[#allocation7 + $0x20] sm:$0xff]   ;;  %v2094_v5 = vld [vmem:[#allocation7 + $0x18] sm:$0xff]   ;;  %v2621_v32 = vstv %s1742_s12  ;;  %s1741_s23 = sshll.u32 %s2570_s24, 7  ;;  %s1848_s2 = sshll.u32 %s2444_s0, 11 }
  0x69   : > { %1898 = vmatpush3.bf16.msra.mxu0 %v2090_v0  ;;  %v2098_v4 = vld [vmem:[%s2574_s11] sm:$0xff]   ;;  %v2095_v6 = vld [vmem:[#allocation7 + $0x10] sm:$0xff]   ;;  %v2106_v7 = vld [vmem:[#allocation9 + $0x38] sm:$0xff]   ;;  %v2617_v30 = vshrl.u32 %v580_v29, 7  ;;  %v598_v34 = vand.u32 127, %v580_v29  ;;  %s3150_s28 = scalar_lea.vmem [#allocation12], %s1741_s23 }
  0x6a   : > { %1899 = vmatprep.subr.bf16.mxu0 %v2091_v1  ;;  %1913 = vmatprep.mubr.bf16.mxu0 %v2098_v4  ;;  %v2107_v8 = vld [vmem:[#allocation9 + $0x30] sm:$0xff]   ;;  %v2096_v9 = vld [vmem:[#allocation7 + $0x8] sm:$0xff]   ;;  %v2097_v11 = vld [vmem:[#allocation7] sm:$0xff]   ;;  %s1625_s21 = sshll.u32 %s3150_s28, 4  ;;  %p3331_p1 = scmp.ne.s32.totalorder %s3239_s25, 0  ;;  %s3173_s21 = int_to_ptr.vmem [resolvable:$true] %s1625_s21 }
  0x6b   : > { %1929 = vmatprep.subr.bf16.mxu1 %v2106_v7  ;;  %v2108_v10 = vld [vmem:[#allocation9 + $0x28] sm:$0xff]   ;;  %v2109_v12 = vld [vmem:[#allocation9 + $0x20] sm:$0xff]   ;;  %v2110_v13 = vld [vmem:[#allocation9 + $0x18] sm:$0xff]   ;;  %v583_v31 = vadd.s32 16, %v2617_v30  ;;  %v584_v35 = vadd.s32 24, %v2617_v30  ;;  %v600_v37 = vadd.s32 %v2621_v32, %v2617_v30  ;;  %v582_v39 = vadd.s32 8, %v2617_v30 }
  0x6c   : > { %1930 = vmatpush3.bf16.msra.mxu1 %v2106_v7  ;;  %v2099_v14 = vld [vmem:[%s2574_s11 + $0x8] sm:$0xff]   ;;  %v2100_v15 = vld [vmem:[%s2574_s11 + $0x10] sm:$0xff]   ;;  %v2101_v16 = vld [vmem:[%s2574_s11 + $0x18] sm:$0xff]   ;;  %v2627_v38 = vmul.u32 2246822519, %v598_v34  ;;  %v585_v41 = vadd.s32 32, %v2617_v30 }
  0x6d   : > { %1900 = vmatpush3.bf16.msra.mxu0 %v2091_v1  ;;  %1931 = vmatprep.subr.bf16.mxu1 %v2107_v8  ;;  %v2102_v17 = vld [vmem:[%s2574_s11 + $0x20] sm:$0xff]   ;;  %v2103_v18 = vld [vmem:[%s2574_s11 + $0x28] sm:$0xff]   ;;  %v2104_v19 = vld [vmem:[%s2574_s11 + $0x30] sm:$0xff]   ;;  %v602_v33 = vadd.s32 %v2621_v32, %v583_v31  ;;  %s649_s15 = smul.u32 668265263, %s346_s14  ;;  %v603_v40 = vadd.s32 %v2621_v32, %v584_v35  ;;  %v587_v42 = vadd.s32 48, %v2617_v30  ;;  %v601_v46 = vadd.s32 %v2621_v32, %v582_v39  ;;  %s3171_s14 = scalar_lea.hbm %s3226_s8, %s1848_s2 }
  0x6e   : > { %1901 = vmatprep.subr.bf16.mxu0 %v2092_v2  ;;  %v2105_v20 = vld [vmem:[%s2574_s11 + $0x38] sm:$0xff]   ;;  %v2111_v21 = vld [vmem:[#allocation9 + $0x10] sm:$0xff]   ;;  %v2112_v22 = vld [vmem:[#allocation9 + $0x8] sm:$0xff]   ;;  %v616_v43 = vmul.u32 2654435761, %v600_v37  ;;  %v604_v48 = vadd.s32 %v2621_v32, %v585_v41  ;;  %v588_v49 = vadd.s32 56, %v2617_v30 }
  0x6f   : > { %v2113_v23 = vld [vmem:[#allocation9] sm:$0xff]   ;;  %v2596_v24 = vld [vmem:[#allocation10 + $0x38] sm:$0xff]   ;;  %v2598_v25 = vld [vmem:[#allocation10 + $0x30] sm:$0xff]   ;;  %v618_v36 = vmul.u32 2654435761, %v602_v33  ;;  %v2634_v45 = vstv %s649_s15  ;;  %v586_v50 = vadd.s32 40, %v2617_v30  ;;  %v606_v51 = vadd.s32 %v2621_v32, %v587_v42 }
  0x70   : > { %1932 = vmatpush3.bf16.msra.mxu1 %v2107_v8  ;;  %v2604_v26 = vld [vmem:[#allocation10 + $0x28] sm:$0xff]   ;;  %v2608_v27 = vld [vmem:[#allocation10 + $0x20] sm:$0xff]   ;;  %v2612_v28 = vld [vmem:[#allocation10 + $0x18] sm:$0xff]   ;;  %v619_v47 = vmul.u32 2654435761, %v603_v40  ;;  %v633_v52 = vadd.s32 %v2627_v38, %v616_v43  ;;  %v607_v57 = vadd.s32 %v2621_v32, %v588_v49  ;;  %v589_v7 = vadd.s32 64, %v2617_v30 }
  0x71   : > { %1902 = vmatpush3.bf16.msra.mxu0 %v2092_v2  ;;  %1933 = vmatprep.subr.bf16.mxu1 %v2108_v10  ;;  %v635_v44 = vadd.s32 %v2627_v38, %v618_v36  ;;  %v617_v54 = vmul.u32 2654435761, %v601_v46  ;;  %v620_v56 = vmul.u32 2654435761, %v604_v48  ;;  %v605_v58 = vadd.s32 %v2621_v32, %v586_v50  ;;  %s1612_s15 = scalar_lea.sflag [#allocation6], %s2570_s24  ;;  %s2292_s18 = scalar_lea.vmem %s3173_s21, 2048 }
  0x72   : > { %1903 = vmatprep.subr.bf16.mxu0 %v2093_v3  ;;  %v636_v55 = vadd.s32 %v2627_v38, %v619_v47  ;;  %v622_v59 = vmul.u32 2654435761, %v606_v51  ;;  %v2649_v60 = vadd.s32 %v2634_v45, %v633_v52  ;;  %v623_v1 = vmul.u32 2654435761, %v607_v57  ;;  %p2293_p7 = scmp.ne.s32.totalorder %s3173_s21, %s2292_s18  ;;  %s2372_s0 = smov [#allocation12]  }
  0x73   : > { %v2643_v53 = vadd.s32 %v2634_v45, %v635_v44  ;;  %v634_v62 = vadd.s32 %v2627_v38, %v617_v54  ;;  %v637_v0 = vadd.s32 %v2627_v38, %v620_v56  ;;  %v621_v2 = vmul.u32 2654435761, %v605_v58  ;;  %s2296_s17 = sshll.u32 %s2372_s0, 4  ;;  %s2297_s17 = int_to_ptr.vmem [resolvable:$false] %s2296_s17 }
  0x74   : > { %1934 = vmatpush3.bf16.msra.mxu1 %v2108_v10  ;;  %v2654_v63 = vadd.s32 %v2634_v45, %v636_v55  ;;  %v667_v4 = vadd.s32 1, %v2649_v60  ;;  %v640_v10 = vadd.s32 %v2627_v38, %v623_v1  ;;  %v593_v40 = vadd.s32 96, %v2617_v30  ;;  %p2294_p12 = pnand %p2293_p7, %p3331_p1  ;;  %s2298_s20 = scalar_lea.vmem %s2297_s17, 4096 }
  0x75   : > { %1904 = vmatpush3.bf16.msra.mxu0 %v2093_v3  ;;  %1935 = vmatprep.subr.bf16.mxu1 %v2109_v12  ;;  %v669_v61 = vadd.s32 1, %v2643_v53  ;;  %v639_v3 = vadd.s32 %v2627_v38, %v622_v59  ;;  %v596_v48 = vadd.s32 120, %v2617_v30  ;;  %v594_v52 = vadd.s32 104, %v2617_v30  ;;  %p2299_p13 = scmp.lt.s32.totalorder %s3173_s21, %s2297_s17  ;;  %p2300_p0 = scmp.lt.s32.totalorder %s2298_s20, %s2292_s18 }
  0x76   : > { %1905 = vmatprep.subr.bf16.mxu0 %v2094_v5  ;;  %v670_v8 = vadd.s32 1, %v2654_v63  ;;  %v595_v56 = vadd.s32 112, %v2617_v30  ;;  %v612_v57 = vadd.s32 %v2621_v32, %v593_v40  ;;  %p2295_p9 = pneg %p2294_p12 }
  0x77   : > { %p2301_p2 = por %p2300_p0, %p2299_p13 }
  0x78   : > { %1936 = vmatpush3.bf16.msra.mxu1 %v2109_v12  ;;  %v591_v12 = vadd.s32 80, %v2617_v30 }
  0x79   : > { %1906 = vmatpush3.bf16.msra.mxu0 %v2094_v5  ;;  %1937 = vmatprep.subr.bf16.mxu1 %v2110_v13  ;;  %v685_v5 = vshrl.u32 %v669_v61, 16  ;;  %p2302_p10 = pnand %p2301_p2, %p2295_p9 }
  0x7a   : > { %1907 = vmatprep.subr.bf16.mxu0 %v2095_v6  ;;  %v610_v29 = vadd.s32 %v2621_v32, %v591_v12  ;;  %v628_v12 = vmul.u32 2654435761, %v612_v57 }
  0x7c   : > { %1938 = vmatpush3.bf16.msra.mxu1 %v2110_v13  ;;  %v592_v13 = vadd.s32 88, %v2617_v30  ;;  %v626_v46 = vmul.u32 2654435761, %v610_v29 }
  0x7d   : > { %1908 = vmatpush3.bf16.msra.mxu0 %v2095_v6  ;;  %1939 = vmatprep.subr.bf16.mxu1 %v2111_v21  ;;  %v2660_v6 = vadd.s32 %v2634_v45, %v634_v62 }
  0x7e   : > { %1909 = vmatprep.subr.bf16.mxu0 %v2096_v9  ;;  %v611_v31 = vadd.s32 %v2621_v32, %v592_v13  ;;  %v643_v1 = vadd.s32 %v2627_v38, %v626_v46 }
  0x80   : > { %1940 = vmatpush3.bf16.msra.mxu1 %v2111_v21  ;;  %v627_v47 = vmul.u32 2654435761, %v611_v31 }
  0x81   : > { %1910 = vmatpush3.bf16.msra.mxu0 %v2096_v9  ;;  %1941 = vmatprep.subr.bf16.mxu1 %v2112_v22  ;;  %v2665_v9 = vadd.s32 %v2634_v45, %v637_v0 }
  0x82   : > { %1911 = vmatprep.subr.bf16.mxu0 %v2097_v11 }
  0x83   : > { %v671_v21 = vadd.s32 1, %v2665_v9 }
  0x84   : > { %1942 = vmatpush3.bf16.msra.mxu1 %v2112_v22  ;;  %v2679_v22 = vadd.s32 %v2634_v45, %v640_v10 }
  0x85   : > { %1912 = vmatpush3.bf16.msra.mxu0 %v2097_v11  ;;  %1943 = vmatprep.subr.bf16.mxu1 %v2113_v23  ;;  %v638_v11 = vadd.s32 %v2627_v38, %v621_v2  ;;  %v687_v42 = vshrl.u32 %v671_v21, 16  ;;  %v644_v2 = vadd.s32 %v2627_v38, %v627_v47 }
  0x86   : > { %1961 = vmatprep.subr.bf16.mxu0 %v2596_v24  ;;  %v674_v43 = vadd.s32 1, %v2679_v22 }
  0x87   : > { %v703_v59 = vxor.u32 %v687_v42, %v671_v21 }
  0x88   : > { %1914 = vmatmul.mubr.bf16.vlgmr.msra.gmra.mxu0 %v2099_v14  ;;  %1944 = vmatpush3.bf16.msra.mxu1 %v2113_v23  ;;  %v2672_v14 = vadd.s32 %v2634_v45, %v639_v3  ;;  %v2682_v23 = vadd.s32 %v2634_v45, %v638_v11  ;;  %v615_v3 = vadd.s32 %v2621_v32, %v596_v48 }
  0x89   : > { %1917 = vmatprep.mubr.bf16.mxu0 %v2100_v15  ;;  %1993 = vmatprep.subr.bf16.mxu1 %v2596_v24  ;;  %v683_v15 = vshrl.u32 %v667_v4, 16  ;;  %v614_v11 = vadd.s32 %v2621_v32, %v595_v56 }
  0x8a   : > { %1962 = vmatpush3.bf16.msra.mxu0 %v2596_v24  ;;  %v673_v33 = vadd.s32 1, %v2672_v14  ;;  %v672_v44 = vadd.s32 1, %v2682_v23  ;;  %v631_v21 = vmul.u32 2654435761, %v615_v3 }
  0x8b   : > { %1963 = vmatprep.subr.bf16.mxu0 %v2598_v25  ;;  %v699_v34 = vxor.u32 %v683_v15, %v667_v4  ;;  %v719_v15 = vmul.u32 2246822507, %v703_v59 }
  0x8c   : > { %v689_v49 = vshrl.u32 %v673_v33, 16  ;;  %v688_v62 = vshrl.u32 %v672_v44, 16  ;;  %v648_v47 = vadd.s32 %v2627_v38, %v631_v21 }
  0x8d   : > { %v715_v50 = vmul.u32 2246822507, %v699_v34  ;;  %v735_v40 = vshrl.u32 %v719_v15, 13 }
  0x8e   : > { %1964 = vmatpush3.bf16.msra.mxu0 %v2598_v25  ;;  %v705_v4 = vxor.u32 %v689_v49, %v673_v33 }
  0x8f   : > { %1965 = vmatprep.subr.bf16.mxu0 %v2604_v26 }
  0x90   : > { %1918 = vmatmul.mubr.bf16.gmra.mxu0 %v2101_v16  ;;  %v590_v16 = vadd.s32 72, %v2617_v30  ;;  %v721_v29 = vmul.u32 2246822507, %v705_v4 }
  0x91   : > { %1921 = vmatprep.mubr.bf16.mxu0 %v2102_v17  ;;  %v701_v17 = vxor.u32 %v685_v5, %v669_v61  ;;  %v690_v61 = vshrl.u32 %v674_v43, 16  ;;  %v731_v5 = vshrl.u32 %v715_v50, 13 }
  0x92   : > { %1966 = vmatpush3.bf16.msra.mxu0 %v2604_v26  ;;  %v609_v35 = vadd.s32 %v2621_v32, %v590_v16  ;;  %v737_v48 = vshrl.u32 %v721_v29, 13 }
  0x93   : > { %1967 = vmatprep.subr.bf16.mxu0 %v2608_v27  ;;  %v717_v36 = vmul.u32 2246822507, %v701_v17  ;;  %v706_v16 = vxor.u32 %v690_v61, %v674_v43  ;;  %v704_v17 = vxor.u32 %v688_v62, %v672_v44  ;;  %v747_v31 = vxor.u32 %v731_v5, %v715_v50 }
  0x94   : > { %v625_v51 = vmul.u32 2654435761, %v609_v35  ;;  %v753_v3 = vxor.u32 %v737_v48, %v721_v29 }
  0x95   : > { %v733_v0 = vshrl.u32 %v717_v36, 13  ;;  %v720_v42 = vmul.u32 2246822507, %v704_v17  ;;  %v763_v49 = vmul.u32 3266489909, %v747_v31 }
  0x96   : > { %1968 = vmatpush3.bf16.msra.mxu0 %v2608_v27  ;;  %v769_v31 = vmul.u32 3266489909, %v753_v3 }
  0x97   : > { %1969 = vmatprep.subr.bf16.mxu0 %v2612_v28  ;;  %v736_v61 = vshrl.u32 %v720_v42, 13  ;;  %v779_v4 = vshrl.u32 %v763_v49, 16 }
  0x98   : > { %1922 = vmatmul.mubr.bf16.gmra.mxu0 %v2103_v18  ;;  %v668_v18 = vadd.s32 1, %v2660_v6 }
  0x99   : > { %1925 = vmatprep.mubr.bf16.mxu0 %v2104_v19  ;;  %v608_v19 = vadd.s32 %v2621_v32, %v589_v7  ;;  %v642_v7 = vadd.s32 %v2627_v38, %v625_v51 }
  0x9a   : > { %1970 = vmatpush3.bf16.msra.mxu0 %v2612_v28  ;;  %v684_v37 = vshrl.u32 %v668_v18, 16 }
  0x9b   : > { %v624_v39 = vmul.u32 2654435761, %v608_v19  ;;  %v2706_v19 = vadd.s32 %v2634_v45, %v643_v1  ;;  %v2712_v33 = vadd.s32 %v2634_v45, %v642_v7 }
  0x9c   : > { %v700_v54 = vxor.u32 %v684_v37, %v668_v18  ;;  %v749_v18 = vxor.u32 %v733_v0, %v717_v36  ;;  %v630_v37 = vmul.u32 2654435761, %v614_v11 }
  0x9d   : > { %v641_v55 = vadd.s32 %v2627_v38, %v624_v39  ;;  %v645_v39 = vadd.s32 %v2627_v38, %v628_v12  ;;  %v677_v44 = vadd.s32 1, %v2706_v19  ;;  %v676_v50 = vadd.s32 1, %v2712_v33 }
  0x9e   : > { %v716_v30 = vmul.u32 2246822507, %v700_v54  ;;  %v765_v43 = vmul.u32 3266489909, %v749_v18 }
  0x9f   : > { %v2702_v10 = vadd.s32 %v2634_v45, %v641_v55  ;;  %v647_v55 = vadd.s32 %v2627_v38, %v630_v37  ;;  %v2723_v56 = vadd.s32 %v2634_v45, %v645_v39  ;;  %v693_v0 = vshrl.u32 %v677_v44, 16 }
  0xa0   : > { %1926 = vmatmul.mubr.bf16.gmra.mxu0 %v2105_v20  ;;  %v686_v20 = vshrl.u32 %v670_v8, 16  ;;  %v781_v62 = vshrl.u32 %v765_v43, 16  ;;  %v692_v5 = vshrl.u32 %v676_v50, 16 }
  0xa1   : > { %v675_v35 = vadd.s32 1, %v2702_v10  ;;  %v679_v11 = vadd.s32 1, %v2723_v56  ;;  %v709_v18 = vxor.u32 %v693_v0, %v677_v44 }
  0xa2   : > { %v702_v41 = vxor.u32 %v686_v20, %v670_v8  ;;  %v613_v8 = vadd.s32 %v2621_v32, %v594_v52  ;;  %v2709_v20 = vadd.s32 %v2634_v45, %v644_v2  ;;  %v732_v32 = vshrl.u32 %v716_v30, 13 }
  0xa3   : > { %v691_v54 = vshrl.u32 %v675_v35, 16  ;;  %v2726_v2 = vadd.s32 %v2634_v45, %v648_v47  ;;  %v797_v17 = vxor.u32 %v781_v62, %v765_v43 }
  0xa4   : > { %v718_v58 = vmul.u32 2246822507, %v702_v41  ;;  %v629_v34 = vmul.u32 2654435761, %v613_v8  ;;  %v678_v46 = vadd.s32 1, %v2709_v20  ;;  %v748_v52 = vxor.u32 %v732_v32, %v716_v30 }
  0xa5   : > { %v722_v41 = vmul.u32 2246822507, %v706_v16  ;;  %v707_v8 = vxor.u32 %v691_v54, %v675_v35  ;;  %v2732_v30 = vadd.s32 %v2634_v45, %v647_v55  ;;  %v752_v16 = vxor.u32 %v736_v61, %v720_v42 }
  0xa6   : > { %v734_v13 = vshrl.u32 %v718_v58, 13  ;;  %v646_v51 = vadd.s32 %v2627_v38, %v629_v34  ;;  %v694_v1 = vshrl.u32 %v678_v46, 16  ;;  %v764_v38 = vmul.u32 3266489909, %v748_v52 }
  0xa7   : > { %v738_v59 = vshrl.u32 %v722_v41, 13  ;;  %v682_v29 = vadd.s32 1, %v2726_v2  ;;  %v795_v34 = vxor.u32 %v779_v4, %v763_v49  ;;  %v708_v32 = vxor.u32 %v692_v5, %v676_v50 }
  0xa8   : > { %v750_v36 = vxor.u32 %v734_v13, %v718_v58  ;;  %v751_v58 = vxor.u32 %v735_v40, %v719_v15  ;;  %v2729_v7 = vadd.s32 %v2634_v45, %v646_v51  ;;  %v710_v21 = vxor.u32 %v694_v1, %v678_v46 }
  0xa9   : > { %v754_v15 = vxor.u32 %v738_v59, %v722_v41  ;;  %v780_v35 = vshrl.u32 %v764_v38, 16  ;;  %v723_v39 = vmul.u32 2246822507, %v707_v8  ;;  %v681_v45 = vadd.s32 1, %v2732_v30 }
  0xaa   : > { %v766_v57 = vmul.u32 3266489909, %v750_v36  ;;  %v767_v13 = vmul.u32 3266489909, %v751_v58  ;;  %v680_v37 = vadd.s32 1, %v2729_v7  ;;  %v695_v36 = vshrl.u32 %v679_v11, 16 }
  0xab   : > { %v770_v48 = vmul.u32 3266489909, %v754_v15  ;;  %v768_v41 = vmul.u32 3266489909, %v752_v16  ;;  %v698_v44 = vshrl.u32 %v682_v29, 16  ;;  %v813_v46 = vand.u32 2147483648, %v797_v17 }
  0xac   : > { %v782_v12 = vshrl.u32 %v766_v57, 16  ;;  %v783_v47 = vshrl.u32 %v767_v13, 16  ;;  %v725_v42 = vmul.u32 2246822507, %v709_v18  ;;  %v726_v43 = vmul.u32 2246822507, %v710_v21 }
  0xad   : > { %v785_v51 = vshrl.u32 %v769_v31, 16  ;;  %v724_v52 = vmul.u32 2246822507, %v708_v32  ;;  %v696_v54 = vshrl.u32 %v680_v37, 16  ;;  %v796_v49 = vxor.u32 %v780_v35, %v764_v38 }
  0xae   : > { %v798_v40 = vxor.u32 %v782_v12, %v766_v57  ;;  %v739_v50 = vshrl.u32 %v723_v39, 13  ;;  %v697_v55 = vshrl.u32 %v681_v45, 16  ;;  %v711_v58 = vxor.u32 %v695_v36, %v679_v11 }
  0xaf   : > { %v799_v61 = vxor.u32 %v783_v47, %v767_v13  ;;  %v786_v62 = vshrl.u32 %v770_v48, 16  ;;  %v811_v0 = vand.u32 2147483648, %v795_v34  ;;  %v784_v1 = vshrl.u32 %v768_v41, 16  ;;  %v2761_v34 = vld [vmem:[%s3221_s3] ss:$0 sm:$0xff] }
  0xb0   : > { %v814_v59 = vand.u32 2147483648, %v798_v40  ;;  %v741_v57 = vshrl.u32 %v725_v42, 13  ;;  %v742_v3 = vshrl.u32 %v726_v43, 13  ;;  %v714_v4 = vxor.u32 %v698_v44, %v682_v29 }
  0xb1   : > { %v801_v5 = vxor.u32 %v785_v51, %v769_v31  ;;  %v740_v8 = vshrl.u32 %v724_v52, 13  ;;  %v2738_v12 = vxor.u32 %v696_v54, %v680_v37  ;;  %v812_v16 = vand.u32 2147483648, %v796_v49 }
  0xb2   : > { %v2740_v17 = vxor.u32 %v739_v50, %v723_v39  ;;  %v2742_v38 = vxor.u32 %v697_v55, %v681_v45  ;;  %v727_v18 = vmul.u32 2246822507, %v711_v58  ;;  %vm2744_vm0 = vcmp.eq.s32.totalorder %v813_v46, 0 }
  0xb3   : > { %vm2748_vm1 = vcmp.eq.s32.totalorder %v814_v59, 0  ;;  %v815_v21 = vand.u32 2147483648, %v799_v61  ;;  %v2752_v29 = vxor.u32 %v786_v62, %v770_v48  ;;  %vm2754_vm2 = vcmp.eq.s32.totalorder %v811_v0, 0 }
  0xb4   : > { %v2763_v37 = vxor.u32 %v784_v1, %v768_v41  ;;  %v2765_v35 = vxor.u32 %v741_v57, %v725_v42  ;;  %v2767_v39 = vxor.u32 %v742_v3, %v726_v43  ;;  %v730_v45 = vmul.u32 2246822507, %v714_v4 }
  0xb5   : > { %v817_v40 = vand.u32 2147483648, %v801_v5  ;;  %v2770_v47 = vxor.u32 %v740_v8, %v724_v52  ;;  %v728_v48 = vmul.u32 2246822507, %v2738_v12  ;;  %vm2773_vm3 = vcmp.eq.s32.totalorder %v812_v16, 0 }
  0xb6   : > { %v771_v41 = vmul.u32 3266489909, %v2740_v17  ;;  %v729_v42 = vmul.u32 2246822507, %v2742_v38  ;;  %v743_v51 = vshrl.u32 %v727_v18, 13  ;;  %vm2781_vm4 = vcmp.eq.s32.totalorder %v815_v21, 0 }
  0xb7   : > { %v818_v52 = vand.u32 2147483648, %v2752_v29  ;;  %v816_v55 = vand.u32 2147483648, %v2763_v37  ;;  %v773_v58 = vmul.u32 3266489909, %v2765_v35  ;;  %v774_v59 = vmul.u32 3266489909, %v2767_v39 }
  0xb8   : > { %v746_v61 = vshrl.u32 %v730_v45, 13  ;;  %v772_v0 = vmul.u32 3266489909, %v2770_v47  ;;  %v744_v1 = vshrl.u32 %v728_v48, 13  ;;  %v787_v5 = vshrl.u32 %v771_v41, 16 }
  0xb9   : > { %v745_v8 = vshrl.u32 %v729_v42, 13  ;;  %v2797_v12 = vxor.u32 %v743_v51, %v727_v18  ;;  %vm2805_vm10 = vcmp.eq.s32.totalorder %v817_v40, 0  ;;  %v789_v31 = vshrl.u32 %v773_v58, 16 }
  0xba   : > { %v790_v13 = vshrl.u32 %v774_v59, 16  ;;  %v788_v39 = vshrl.u32 %v772_v0, 16  ;;  %v1083_v18 = vadd.s32 2, %v2649_v60  ;;  %v1088_v60 = vadd.s32 2, %v2682_v23 }
  0xbb   : > { %v775_v46 = vmul.u32 3266489909, %v2797_v12  ;;  %v1091_v23 = vadd.s32 2, %v2702_v10 }
 0x148   : > { %v1915_v15 = vpop.f32.mrf.mxu0 }
 0x149   : > { %v526_v43 = vadd.f32 %v1915_v15, %v2761_v34 }
 0x14a   : > { %v517_v32 = vpop.f32.mrf.mxu0 }
 0x14b   : > { %v518_v36 = vadd.f32 %v2761_v34, %v517_v32  ;;  %vm845_vm8 = vcmp.gt.f32.partialorder %v526_v43, 0.0  ;;  %v877_v21 = vmul.f32 2.0, %v526_v43  ;;  %v2815_v32 = vxor.u32 %v746_v61, %v730_v45 }
 0x14c   : > { %v1916_v44 = vpop.f32.mrf.mxu0  ;;  %vm861_vm14 = vmand %vm2744_vm0, %vm845_vm8  ;;  %v2827_v45 = vxor.u32 %v745_v8, %v729_v42  ;;  %v806_v42 = vxor.u32 %v790_v13, %v774_v59  ;;  %v804_v61 = vxor.u32 %v788_v39, %v772_v0 }
 0x14d   : > { %v529_v54 = vadd.f32 %v1916_v44, %v2761_v34  ;;  %vm843_vm5 = vcmp.gt.f32.partialorder %v518_v36, 0.0  ;;  %v875_v15 = vmul.f32 2.0, %v518_v36  ;;  %v2822_v36 = vxor.u32 %v744_v1, %v728_v48 }
 0x14e   : > { %v520_v50 = vpop.f32.mrf.mxu0  ;;  %vm2793_vm7 = vmand %vm2754_vm2, %vm843_vm5  ;;  %v803_v44 = vxor.u32 %v787_v5, %v771_v41  ;;  %vm2838_vm2 = vcmp.eq.s32.totalorder %v816_v55, 0  ;;  %v805_v41 = vxor.u32 %v789_v31, %v773_v58  ;;  %v778_v43 = vmul.u32 3266489909, %v2815_v32 }
 0x14f   : > { %vm846_vm6 = vcmp.gt.f32.partialorder %v529_v54, 0.0  ;;  %v521_v62 = vadd.f32 %v2761_v34, %v520_v50  ;;  %v878_v57 = vmul.f32 2.0, %v529_v54  ;;  %v822_v12 = vand.u32 2147483648, %v806_v42 }
 0x150   : > { %v1919_v3 = vpop.f32.mrf.mxu0  ;;  %vm2801_vm9 = vmand %vm2748_vm1, %vm846_vm6  ;;  %vm2832_vm1 = vcmp.eq.s32.totalorder %v818_v52, 0  ;;  %v819_v59 = vand.u32 2147483648, %v803_v44  ;;  %v821_v13 = vand.u32 2147483648, %v805_v41 }
 0x151   : > { %v876_v17 = vmul.f32 2.0, %v521_v62  ;;  %vm844_vm11 = vcmp.gt.f32.partialorder %v521_v62, 0.0  ;;  %v1773_v40 = vpack.c.bf16 %v878_v57, %v877_v21  ;;  %v542_v51 = vadd.f32 %v1919_v3, %v2761_v34  ;;  %vm1772_vm0 = vmpackc.low %vm2801_vm9, %vm861_vm14 }
 0x152   : > { %v533_v29 = vpop.f32.mrf.mxu0  ;;  %vm2811_vm12 = vmand %vm2773_vm3, %vm844_vm11  ;;  %v776_v62 = vmul.u32 3266489909, %v2822_v36  ;;  %v777_v57 = vmul.u32 3266489909, %v2827_v45  ;;  %v791_v3 = vshrl.u32 %v775_v46, 16  ;;  %v820_v21 = vand.u32 2147483648, %v804_v61 }
 0x153   : > { %v534_v37 = vadd.f32 %v2761_v34, %v533_v29  ;;  %vm1769_vm13 = vmpackc.low %vm2811_vm12, %vm2793_vm7  ;;  %v1770_v35 = vpack.c.bf16 %v876_v17, %v875_v15  ;;  %vm849_vm6 = vcmp.gt.f32.partialorder %v542_v51, 0.0  ;;  %v881_v4 = vmul.f32 2.0, %v542_v51 }
 0x154   : > { %v1920_v47 = vpop.f32.mrf.mxu0  ;;  %v794_v15 = vshrl.u32 %v778_v43, 16  ;;  %v792_v29 = vshrl.u32 %v776_v62, 16  ;;  %vm2876_vm11 = vmand %vm2805_vm10, %vm849_vm6  ;;  %vm2882_vm12 = vcmp.eq.s32.totalorder %v819_v59, 0  ;;  %vm2891_vm14 = vcmp.eq.s32.totalorder %v822_v12, 0 }
 0x155   : > { %vm847_vm15 = vcmp.gt.f32.partialorder %v534_v37, 0.0  ;;  %v545_v54 = vadd.f32 %v1920_v47, %v2761_v34  ;;  %1945 = vmatprep.mubr.msk.bf16.mxu1 %vm1769_vm13, %v1770_v35  ;;  %v879_v0 = vmul.f32 2.0, %v534_v37  ;;  %v793_v37 = vshrl.u32 %v777_v57, 16 }
 0x156   : > { %v536_v11 = vpop.f32.mrf.mxu0  ;;  %1946 = vmatmul.mubr.msk.bf16.vlgmr.msra.gmra.mxu1 %vm1772_vm0, %v1773_v40  ;;  %vm2849_vm5 = vmand %vm2781_vm4, %vm847_vm15  ;;  %v807_v35 = vxor.u32 %v791_v3, %v775_v46  ;;  %v810_v47 = vxor.u32 %v794_v15, %v778_v43  ;;  %v808_v46 = vxor.u32 %v792_v29, %v776_v62  ;;  %vm2901_vm0 = vcmp.eq.s32.totalorder %v821_v13, 0 }
 0x157   : > { %vm850_vm3 = vcmp.gt.f32.partialorder %v545_v54, 0.0  ;;  %v537_v52 = vadd.f32 %v2761_v34, %v536_v11  ;;  %2001 = vmatpush3.bf16.msra.mxu1 %v2596_v24  ;;  %v882_v1 = vmul.f32 2.0, %v545_v54  ;;  %v809_v48 = vxor.u32 %v793_v37, %v777_v57 }
 0x158   : > { %v1923_v58 = vpop.f32.mrf.mxu0  ;;  %1994 = vmatprep.subr.bf16.mxu1 %v2598_v25  ;;  %vm2857_vm7 = vmand %vm2832_vm1, %vm850_vm3  ;;  %vm2896_vm1 = vcmp.eq.s32.totalorder %v820_v21, 0  ;;  %v823_v41 = vand.u32 2147483648, %v807_v35  ;;  %v826_v55 = vand.u32 2147483648, %v810_v47  ;;  %v824_v59 = vand.u32 2147483648, %v808_v46  ;;  %v2121_v21 = vld [vmem:[#allocation10] sm:$0xff]  }
 0x159   : > { %vm848_vm4 = vcmp.gt.f32.partialorder %v537_v52, 0.0  ;;  %v880_v49 = vmul.f32 2.0, %v537_v52  ;;  %v1779_v31 = vpack.c.bf16 %v882_v1, %v881_v4  ;;  %v558_v39 = vadd.f32 %v1923_v58, %v2761_v34  ;;  %vm1778_vm10 = vmpackc.low %vm2857_vm7, %vm2876_vm11 }
 0x15a   : > { %vm2863_vm8 = vmand %vm2838_vm2, %vm848_vm4  ;;  %v549_v8 = vpop.f32.mrf.mxu0  ;;  %v825_v3 = vand.u32 2147483648, %v809_v48  ;;  %v1085_v29 = vadd.s32 2, %v2643_v53  ;;  %v1084_v37 = vadd.s32 2, %v2660_v6  ;;  %v1090_v53 = vadd.s32 2, %v2679_v22 }
 0x15b   : > { %v1776_v16 = vpack.c.bf16 %v880_v49, %v879_v0  ;;  %v550_v17 = vadd.f32 %v2761_v34, %v549_v8  ;;  %vm1775_vm9 = vmpackc.low %vm2863_vm8, %vm2849_vm5  ;;  %2002 = vmatpush3.bf16.msra.mxu1 %v2598_v25  ;;  %vm853_vm3 = vcmp.gt.f32.partialorder %v558_v39, 0.0  ;;  %v885_v52 = vmul.f32 2.0, %v558_v39 }
 0x15c   : > { %v1924_v32 = vpop.f32.mrf.mxu0  ;;  %1995 = vmatprep.subr.bf16.mxu1 %v2604_v26  ;;  %vm869_vm8 = vmand %vm2901_vm0, %vm853_vm3  ;;  %v1101_v13 = vshrl.u32 %v1085_v29, 16  ;;  %v1087_v39 = vadd.s32 2, %v2665_v9  ;;  %v1100_v38 = vshrl.u32 %v1084_v37, 16  ;;  %v1104_v9 = vshrl.u32 %v1088_v60, 16 }
 0x15d   : > { %vm851_vm13 = vcmp.gt.f32.partialorder %v550_v17, 0.0  ;;  %v561_v25 = vadd.f32 %v1924_v32, %v2761_v34  ;;  %1949 = vmatprep.mubr.msk.bf16.mxu1 %vm1775_vm9, %v1776_v16  ;;  %v883_v42 = vmul.f32 2.0, %v550_v17  ;;  %vm839_vm9 = vcmp.eq.s32.totalorder %v823_v41, 0 }
 0x15e   : > { %v552_v40 = vpop.f32.mrf.mxu0  ;;  %1950 = vmatmul.mubr.msk.bf16.gmra.mxu1 %vm1778_vm10, %v1779_v31  ;;  %vm2907_vm2 = vmand %vm2882_vm12, %vm851_vm13  ;;  %vm842_vm13 = vcmp.eq.s32.totalorder %v826_v55, 0  ;;  %v1086_v31 = vadd.s32 2, %v2654_v63  ;;  %v1099_v32 = vshrl.u32 %v1083_v18, 16  ;;  %v1117_v36 = vxor.u32 %v1101_v13, %v1085_v29 }
 0x15f   : > { %vm854_vm15 = vcmp.gt.f32.partialorder %v561_v25, 0.0  ;;  %v553_v44 = vadd.f32 %v2761_v34, %v552_v40  ;;  %2003 = vmatpush3.bf16.msra.mxu1 %v2604_v26  ;;  %v886_v50 = vmul.f32 2.0, %v561_v25  ;;  %v1089_v40 = vadd.s32 2, %v2672_v14 }
 0x160   : > { %v1927_v11 = vpop.f32.mrf.mxu0  ;;  %1996 = vmatprep.subr.bf16.mxu1 %v2608_v27  ;;  %vm2914_vm5 = vmand %vm2891_vm14, %vm854_vm15  ;;  %vm840_vm14 = vcmp.eq.s32.totalorder %v824_v59, 0  ;;  %vm841_vm15 = vcmp.eq.s32.totalorder %v825_v3, 0  ;;  %v1102_v35 = vshrl.u32 %v1086_v31, 16  ;;  %v1115_v25 = vxor.u32 %v1099_v32, %v1083_v18 }
 0x161   : > { %vm852_vm6 = vcmp.gt.f32.partialorder %v553_v44, 0.0  ;;  %v884_v43 = vmul.f32 2.0, %v553_v44  ;;  %v1785_v57 = vpack.c.bf16 %v886_v50, %v885_v52  ;;  %v574_v24 = vadd.f32 %v1927_v11, %v2761_v34  ;;  %vm1784_vm12 = vmpackc.low %vm2914_vm5, %vm869_vm8 }
 0x162   : > { %vm2920_vm7 = vmand %vm2896_vm1, %vm852_vm6  ;;  %v565_v62 = vpop.f32.mrf.mxu0  ;;  %v1118_v47 = vxor.u32 %v1102_v35, %v1086_v31  ;;  %v1103_v44 = vshrl.u32 %v1087_v39, 16  ;;  %v1133_v45 = vmul.u32 2246822507, %v1117_v36  ;;  %v1131_v63 = vmul.u32 2246822507, %v1115_v25 }
 0x163   : > { %v1782_v1 = vpack.c.bf16 %v884_v43, %v883_v42  ;;  %v566_v58 = vadd.f32 %v2761_v34, %v565_v62  ;;  %vm1781_vm4 = vmpackc.low %vm2920_vm7, %vm2907_vm2  ;;  %2004 = vmatpush3.bf16.msra.mxu1 %v2608_v27  ;;  %vm857_vm0 = vcmp.gt.f32.partialorder %v574_v24, 0.0  ;;  %v889_v15 = vmul.f32 2.0, %v574_v24 }
 0x164   : > { %v1928_v0 = vpop.f32.mrf.mxu0  ;;  %1997 = vmatprep.subr.bf16.mxu1 %v2612_v28  ;;  %vm873_vm7 = vmand %vm841_vm15, %vm857_vm0  ;;  %v1116_v46 = vxor.u32 %v1100_v38, %v1084_v37  ;;  %v1105_v51 = vshrl.u32 %v1089_v40, 16  ;;  %v1134_v54 = vmul.u32 2246822507, %v1118_v47  ;;  %v1119_v6 = vxor.u32 %v1103_v44, %v1087_v39 }
 0x165   : > { %vm855_vm11 = vcmp.gt.f32.partialorder %v566_v58, 0.0  ;;  %v577_v49 = vadd.f32 %v1928_v0, %v2761_v34  ;;  %1953 = vmatprep.mubr.msk.bf16.mxu1 %vm1781_vm4, %v1782_v1  ;;  %v887_v8 = vmul.f32 2.0, %v566_v58  ;;  %v1106_v50 = vshrl.u32 %v1090_v53, 16 }
 0x166   : > { %v568_v27 = vpop.f32.mrf.mxu0  ;;  %1954 = vmatmul.mubr.msk.bf16.gmra.mxu1 %vm1784_vm12, %v1785_v57  ;;  %vm871_vm1 = vmand %vm839_vm9, %vm855_vm11  ;;  %v1149_v11 = vshrl.u32 %v1133_v45, 13  ;;  %v1147_v48 = vshrl.u32 %v1131_v63, 13  ;;  %v1132_v41 = vmul.u32 2246822507, %v1116_v46  ;;  %v1121_v42 = vxor.u32 %v1105_v51, %v1089_v40 }
 0x167   : > { %vm858_vm10 = vcmp.gt.f32.partialorder %v577_v49, 0.0  ;;  %v569_v4 = vadd.f32 %v2761_v34, %v568_v27  ;;  %2005 = vmatpush3.bf16.msra.mxu1 %v2612_v28  ;;  %v890_v5 = vmul.f32 2.0, %v577_v49  ;;  %v2119_v34 = vld [vmem:[#allocation10 + $0x10] sm:$0xff]   ;;  %v2120_v28 = vld [vmem:[#allocation10 + $0x8] sm:$0xff]   ;;  %v1150_v26 = vshrl.u32 %v1134_v54, 13 }
 0x168   : > { %vm874_vm2 = vmand %vm842_vm13, %vm858_vm10  ;;  %1971 = vmatprep.subr.bf16.mxu0 %v2119_v34  ;;  %1998 = vmatprep.subr.bf16.mxu1 %v2119_v34  ;;  %v1135_v14 = vmul.u32 2246822507, %v1119_v6  ;;  %v1122_v43 = vxor.u32 %v1106_v50, %v1090_v53  ;;  %v1165_v52 = vxor.u32 %v1149_v11, %v1133_v45  ;;  %v1120_v61 = vxor.u32 %v1104_v9, %v1088_v60 }
 0x169   : > { %vm856_vm3 = vcmp.gt.f32.partialorder %v569_v4, 0.0  ;;  %v888_v12 = vmul.f32 2.0, %v569_v4  ;;  %v1791_v17 = vpack.c.bf16 %v890_v5, %v889_v15  ;;  %vm1790_vm4 = vmpackc.low %vm874_vm2, %vm873_vm7  ;;  %1972 = vmatpush3.bf16.msra.mxu0 %v2119_v34  ;;  %v1163_v22 = vxor.u32 %v1147_v48, %v1131_v63 }
 0x16a   : > { %vm872_vm6 = vmand %vm840_vm14, %vm856_vm3  ;;  %1973 = vmatprep.subr.bf16.mxu0 %v2120_v28  ;;  %v1148_v62 = vshrl.u32 %v1132_v41, 13  ;;  %v1137_v55 = vmul.u32 2246822507, %v1121_v42  ;;  %v1166_v1 = vxor.u32 %v1150_v26, %v1134_v54  ;;  %v1151_v58 = vshrl.u32 %v1135_v14, 13 }
 0x16b   : > { %v1788_v16 = vpack.c.bf16 %v888_v12, %v887_v8  ;;  %vm1787_vm5 = vmpackc.low %vm872_vm6, %vm871_vm1  ;;  %2006 = vmatpush3.bf16.msra.mxu1 %v2119_v34  ;;  %v1138_v59 = vmul.u32 2246822507, %v1122_v43  ;;  %v1093_v57 = vadd.s32 2, %v2706_v19  ;;  %v1181_v3 = vmul.u32 3266489909, %v1165_v52 }
 0x16c   : > { %1999 = vmatprep.subr.bf16.mxu1 %v2120_v28  ;;  %v1136_v0 = vmul.u32 2246822507, %v1120_v61  ;;  %v1094_v24 = vadd.s32 2, %v2709_v20  ;;  %v1179_v49 = vmul.u32 3266489909, %v1163_v22  ;;  %v1164_v27 = vxor.u32 %v1148_v62, %v1132_v41 }
 0x16d   : > { %1957 = vmatprep.mubr.msk.bf16.mxu1 %vm1787_vm5, %v1788_v16  ;;  %1974 = vmatpush3.bf16.msra.mxu0 %v2120_v28  ;;  %v1092_v4 = vadd.s32 2, %v2712_v33  ;;  %v1153_v5 = vshrl.u32 %v1137_v55, 13  ;;  %v1107_v8 = vshrl.u32 %v1091_v23, 16  ;;  %v1182_v12 = vmul.u32 3266489909, %v1166_v1 }
 0x16e   : > { %1958 = vmatmul.mubr.msk.bf16.gmra.mxu1 %vm1790_vm4, %v1791_v17  ;;  %1975 = vmatprep.subr.bf16.mxu0 %v2121_v21  ;;  %v1167_v15 = vxor.u32 %v1151_v58, %v1135_v14  ;;  %v1154_v16 = vshrl.u32 %v1138_v59, 13  ;;  %v1109_v17 = vshrl.u32 %v1093_v57, 16  ;;  %v1197_v10 = vshrl.u32 %v1181_v3, 16 }
 0x16f   : > { %2007 = vmatpush3.bf16.msra.mxu1 %v2120_v28  ;;  %v1152_v34 = vshrl.u32 %v1136_v0, 13  ;;  %v1110_v28 = vshrl.u32 %v1094_v24, 16  ;;  %v1180_v29 = vmul.u32 3266489909, %v1164_v27  ;;  %v1108_v19 = vshrl.u32 %v1092_v4, 16 }
 0x170   : > { %2000 = vmatprep.subr.bf16.mxu1 %v2121_v21  ;;  %v1169_v18 = vxor.u32 %v1153_v5, %v1137_v55  ;;  %v1123_v31 = vxor.u32 %v1107_v8, %v1091_v23  ;;  %v1095_v20 = vadd.s32 2, %v2723_v56  ;;  %v1198_v13 = vshrl.u32 %v1182_v12, 16 }
 0x171   : > { %1976 = vmatpush3.bf16.msra.mxu0 %v2121_v21  ;;  %v1183_v32 = vmul.u32 3266489909, %v1167_v15  ;;  %v1170_v37 = vxor.u32 %v1154_v16, %v1138_v59  ;;  %v1125_v33 = vxor.u32 %v1109_v17, %v1093_v57  ;;  %v1213_v35 = vxor.u32 %v1197_v10, %v1181_v3  ;;  %v2978_v15 = vld [vmem:[%s3223_s5] ss:$0 sm:$0xff] }
 0x172   : > { %v1168_v39 = vxor.u32 %v1152_v34, %v1136_v0  ;;  %v1126_v36 = vxor.u32 %v1110_v28, %v1094_v24  ;;  %v1098_v25 = vadd.s32 2, %v2726_v2  ;;  %v1196_v40 = vshrl.u32 %v1180_v29, 16 }
 0x173   : > { %2008 = vmatpush3.bf16.msra.mxu1 %v2121_v21  ;;  %v1195_v21 = vshrl.u32 %v1179_v49, 16  ;;  %v1124_v47 = vxor.u32 %v1108_v19, %v1092_v4  ;;  %v1096_v44 = vadd.s32 2, %v2729_v7  ;;  %v1185_v53 = vmul.u32 3266489909, %v1169_v18 }
 0x174   : > { %v1139_v45 = vmul.u32 2246822507, %v1123_v31  ;;  %v1097_v60 = vadd.s32 2, %v2732_v30  ;;  %v1111_v63 = vshrl.u32 %v1095_v20, 16  ;;  %v1214_v56 = vxor.u32 %v1198_v13, %v1182_v12 }
 0x175   : > { %v1211_v38 = vxor.u32 %v1195_v21, %v1179_v49  ;;  %v1199_v46 = vshrl.u32 %v1183_v32, 16  ;;  %v1186_v51 = vmul.u32 3266489909, %v1170_v37  ;;  %v1141_v54 = vmul.u32 2246822507, %v1125_v33 }
 0x176   : > { %v1184_v6 = vmul.u32 3266489909, %v1168_v39  ;;  %v1142_v50 = vmul.u32 2246822507, %v1126_v36  ;;  %v1114_v11 = vshrl.u32 %v1098_v25, 16  ;;  %v1229_v9 = vand.u32 2147483648, %v1213_v35 }
 0x177   : > { %v1212_v48 = vxor.u32 %v1196_v40, %v1180_v29  ;;  %v1140_v2 = vmul.u32 2246822507, %v1124_v47  ;;  %v1112_v41 = vshrl.u32 %v1096_v44, 16  ;;  %v1201_v42 = vshrl.u32 %v1185_v53, 16 }
 0x178   : > { %v1155_v26 = vshrl.u32 %v1139_v45, 13  ;;  %v1113_v14 = vshrl.u32 %v1097_v60, 16  ;;  %v1127_v7 = vxor.u32 %v1111_v63, %v1095_v20  ;;  %v1227_v43 = vand.u32 2147483648, %v1211_v38 }
 0x179   : > { %v1230_v52 = vand.u32 2147483648, %v1214_v56  ;;  %v1215_v61 = vxor.u32 %v1199_v46, %v1183_v32  ;;  %v1202_v30 = vshrl.u32 %v1186_v51, 16  ;;  %v1200_v22 = vshrl.u32 %v1184_v6, 16 }
 0x17a   : > { %v1157_v62 = vshrl.u32 %v1141_v54, 13  ;;  %v1158_v55 = vshrl.u32 %v1142_v50, 13  ;;  %v1130_v23 = vxor.u32 %v1114_v11, %v1098_v25  ;;  %v1228_v1 = vand.u32 2147483648, %v1212_v48 }
 0x17b   : > { %v1156_v58 = vshrl.u32 %v1140_v2, 13  ;;  %v2955_v59 = vxor.u32 %v1112_v41, %v1096_v44  ;;  %v1217_v3 = vxor.u32 %v1201_v42, %v1185_v53  ;;  %v2957_v0 = vxor.u32 %v1155_v26, %v1139_v45 }
 0x17c   : > { %v2959_v24 = vxor.u32 %v1113_v14, %v1097_v60  ;;  %v1143_v49 = vmul.u32 2246822507, %v1127_v7  ;;  %vm2961_vm8 = vcmp.eq.s32.totalorder %v1229_v9, 0  ;;  %vm2965_vm9 = vcmp.eq.s32.totalorder %v1227_v43, 0 }
 0x17d   : > { %vm2969_vm11 = vcmp.eq.s32.totalorder %v1230_v52, 0  ;;  %v1231_v8 = vand.u32 2147483648, %v1215_v61  ;;  %v2973_v12 = vxor.u32 %v1202_v30, %v1186_v51  ;;  %v2980_v17 = vxor.u32 %v1200_v22, %v1184_v6 }
 0x17e   : > { %v2982_v10 = vxor.u32 %v1157_v62, %v1141_v54  ;;  %v2984_v34 = vxor.u32 %v1158_v55, %v1142_v50  ;;  %v1146_v28 = vmul.u32 2246822507, %v1130_v23  ;;  %vm2987_vm12 = vcmp.eq.s32.totalorder %v1228_v1, 0 }
 0x17f   : > { %v2991_v19 = vxor.u32 %v1156_v58, %v1140_v2  ;;  %v1144_v18 = vmul.u32 2246822507, %v2955_v59  ;;  %v1233_v20 = vand.u32 2147483648, %v1217_v3  ;;  %v1187_v13 = vmul.u32 3266489909, %v2957_v0 }
 0x180   : > { %v1145_v32 = vmul.u32 2246822507, %v2959_v24  ;;  %v1159_v37 = vshrl.u32 %v1143_v49, 13  ;;  %vm2998_vm10 = vcmp.eq.s32.totalorder %v1231_v8, 0  ;;  %v1234_v36 = vand.u32 2147483648, %v2973_v12 }
 0x181   : > { %v1232_v38 = vand.u32 2147483648, %v2980_v17  ;;  %v1189_v40 = vmul.u32 3266489909, %v2982_v10  ;;  %v1190_v47 = vmul.u32 3266489909, %v2984_v34  ;;  %v1162_v44 = vshrl.u32 %v1146_v28, 13 }
 0x182   : > { %v1188_v45 = vmul.u32 3266489909, %v2991_v19  ;;  %v1160_v60 = vshrl.u32 %v1144_v18, 13  ;;  %v1203_v51 = vshrl.u32 %v1187_v13, 16  ;;  %v1161_v54 = vshrl.u32 %v1145_v32, 13 }
 0x183   : > { %v3014_v6 = vxor.u32 %v1159_v37, %v1143_v49  ;;  %vm3022_vm3 = vcmp.eq.s32.totalorder %v1233_v20, 0  ;;  %v1205_v26 = vshrl.u32 %v1189_v40, 16  ;;  %v1206_v14 = vshrl.u32 %v1190_v47, 16 }
 0x184   : > { %v3032_v7 = vxor.u32 %v1162_v44, %v1146_v28  ;;  %v1204_v61 = vshrl.u32 %v1188_v45, 16  ;;  %v3039_v30 = vxor.u32 %v1160_v60, %v1144_v18  ;;  %v1219_v55 = vxor.u32 %v1203_v51, %v1187_v13 }
 0x185   : > { %v3044_v23 = vxor.u32 %v1161_v54, %v1145_v32  ;;  %v1191_v1 = vmul.u32 3266489909, %v3014_v6  ;;  %v1221_v24 = vxor.u32 %v1205_v26, %v1189_v40  ;;  %v1222_v49 = vxor.u32 %v1206_v14, %v1190_v47 }
 0x186   : > { %v1194_v27 = vmul.u32 3266489909, %v3032_v7  ;;  %v1220_v5 = vxor.u32 %v1204_v61, %v1188_v45  ;;  %v1192_v8 = vmul.u32 3266489909, %v3039_v30  ;;  %v1235_v10 = vand.u32 2147483648, %v1219_v55 }
 0x187   : > { %v1193_v34 = vmul.u32 3266489909, %v3044_v23  ;;  %v1207_v28 = vshrl.u32 %v1191_v1, 16  ;;  %v1238_v13 = vand.u32 2147483648, %v1222_v49 }
 0x188   : > { %v1210_v32 = vshrl.u32 %v1194_v27, 16  ;;  %v1208_v39 = vshrl.u32 %v1192_v8, 16 }
 0x189   : > { %v1209_v40 = vshrl.u32 %v1193_v34, 16  ;;  %v1223_v47 = vxor.u32 %v1207_v28, %v1191_v1 }
 0x18a   : > { %v1226_v63 = vxor.u32 %v1210_v32, %v1194_v27 }
 0x18b   : > { %v1225_v11 = vxor.u32 %v1209_v40, %v1193_v34 }
 0x18c   : > { %v1242_v7 = vand.u32 2147483648, %v1226_v63 }
 0x216   : > { %v1947_v57 = vpop.f32.mrf.mxu1 }
 0x217   : > { %v1029_v33 = vadd.f32 %v1947_v57, %v2978_v15 }
 0x218   : > { %v1020_v16 = vpop.f32.mrf.mxu1 }
 0x219   : > { %v1021_v21 = vadd.f32 %v2978_v15, %v1020_v16  ;;  %vm1261_vm1 = vcmp.gt.f32.partialorder %v1029_v33, 0.0  ;;  %v1293_v2 = vmul.f32 2.0, %v1029_v33 }
 0x21a   : > { %v1948_v31 = vpop.f32.mrf.mxu1  ;;  %vm1277_vm7 = vmand %vm2961_vm8, %vm1261_vm1  ;;  %vm3055_vm8 = vcmp.eq.s32.totalorder %v1232_v38, 0 }
 0x21b   : > { %vm1259_vm13 = vcmp.gt.f32.partialorder %v1021_v21, 0.0  ;;  %v1032_v35 = vadd.f32 %v1948_v31, %v2978_v15  ;;  %v1291_v50 = vmul.f32 2.0, %v1021_v21 }
 0x21c   : > { %v1023_v25 = vpop.f32.mrf.mxu1  ;;  %vm3010_vm15 = vmand %vm2965_vm9, %vm1259_vm13 }
 0x21d   : > { %vm1262_vm14 = vcmp.gt.f32.partialorder %v1032_v35, 0.0  ;;  %v1024_v53 = vadd.f32 %v2978_v15, %v1023_v25  ;;  %v1294_v56 = vmul.f32 2.0, %v1032_v35  ;;  %v1236_v35 = vand.u32 2147483648, %v1220_v5 }
 0x21e   : > { %v1951_v46 = vpop.f32.mrf.mxu1  ;;  %vm3018_vm0 = vmand %vm2969_vm11, %vm1262_vm14  ;;  %vm3051_vm11 = vcmp.eq.s32.totalorder %v1234_v36, 0  ;;  %v1237_v25 = vand.u32 2147483648, %v1221_v24 }
 0x21f   : > { %vm1260_vm2 = vcmp.gt.f32.partialorder %v1024_v53, 0.0  ;;  %v1292_v9 = vmul.f32 2.0, %v1024_v53  ;;  %v1806_v22 = vpack.c.bf16 %v1294_v56, %v1293_v2  ;;  %vm1805_vm4 = vmpackc.low %vm3018_vm0, %vm1277_vm7  ;;  %v1045_v58 = vadd.f32 %v1951_v46, %v2978_v15 }
 0x220   : > { %vm3028_vm6 = vmand %vm2987_vm12, %vm1260_vm2  ;;  %v1036_v42 = vpop.f32.mrf.mxu1  ;;  %v1224_v46 = vxor.u32 %v1208_v39, %v1192_v8 }
 0x221   : > { %v1803_v43 = vpack.c.bf16 %v1292_v9, %v1291_v50  ;;  %v1037_v52 = vadd.f32 %v2978_v15, %v1036_v42  ;;  %vm1802_vm5 = vmpackc.low %vm3028_vm6, %vm3010_vm15  ;;  %vm1265_vm14 = vcmp.gt.f32.partialorder %v1045_v58, 0.0  ;;  %v1297_v18 = vmul.f32 2.0, %v1045_v58 }
 0x222   : > { %v1952_v62 = vpop.f32.mrf.mxu1  ;;  %vm1281_vm2 = vmand %vm3022_vm3, %vm1265_vm14  ;;  %vm1251_vm6 = vcmp.eq.s32.totalorder %v1235_v10, 0  ;;  %v1239_v9 = vand.u32 2147483648, %v1223_v47  ;;  %v1240_v61 = vand.u32 2147483648, %v1224_v46 }
 0x223   : > { %vm1263_vm9 = vcmp.gt.f32.partialorder %v1037_v52, 0.0  ;;  %v1048_v59 = vadd.f32 %v1952_v62, %v2978_v15  ;;  %1977 = vmatprep.mubr.msk.bf16.mxu0 %vm1802_vm5, %v1803_v43  ;;  %v1295_v21 = vmul.f32 2.0, %v1037_v52 }
 0x224   : > { %v1039_v3 = vpop.f32.mrf.mxu1  ;;  %1978 = vmatmul.mubr.msk.bf16.vlgmr.msra.gmra.mxu0 %vm1805_vm4, %v1806_v22  ;;  %vm3064_vm13 = vmand %vm2998_vm10, %vm1263_vm9  ;;  %vm3093_vm4 = vcmp.eq.s32.totalorder %v1238_v13, 0  ;;  %vm1252_vm9 = vcmp.eq.s32.totalorder %v1236_v35, 0  ;;  %v1241_v22 = vand.u32 2147483648, %v1225_v11 }
 0x225   : > { %vm1266_vm12 = vcmp.gt.f32.partialorder %v1048_v59, 0.0  ;;  %v1040_v4 = vadd.f32 %v2978_v15, %v1039_v3  ;;  %v1298_v16 = vmul.f32 2.0, %v1048_v59 }
 0x226   : > { %v1955_v17 = vpop.f32.mrf.mxu1  ;;  %vm3071_vm15 = vmand %vm3051_vm11, %vm1266_vm12  ;;  %vm3098_vm11 = vcmp.eq.s32.totalorder %v1237_v25, 0 }
 0x227   : > { %vm1264_vm1 = vcmp.gt.f32.partialorder %v1040_v4, 0.0  ;;  %v1296_v19 = vmul.f32 2.0, %v1040_v4  ;;  %v1812_v36 = vpack.c.bf16 %v1298_v16, %v1297_v18  ;;  %v1061_v44 = vadd.f32 %v1955_v17, %v2978_v15  ;;  %vm1811_vm7 = vmpackc.low %vm3071_vm15, %vm1281_vm2 }
 0x228   : > { %vm3077_vm10 = vmand %vm3055_vm8, %vm1264_vm1  ;;  %v1052_v20 = vpop.f32.mrf.mxu1  ;;  %vm1255_vm2 = vcmp.eq.s32.totalorder %v1239_v9, 0 }
 0x229   : > { %v1809_v37 = vpack.c.bf16 %v1296_v19, %v1295_v21  ;;  %v1053_v33 = vadd.f32 %v2978_v15, %v1052_v20  ;;  %vm1808_vm0 = vmpackc.low %vm3077_vm10, %vm3064_vm13  ;;  %vm1269_vm12 = vcmp.gt.f32.partialorder %v1061_v44, 0.0  ;;  %v1301_v42 = vmul.f32 2.0, %v1061_v44 }
 0x22a   : > { %v1956_v38 = vpop.f32.mrf.mxu1  ;;  %vm1285_vm10 = vmand %vm3098_vm11, %vm1269_vm12 }
 0x22b   : > { %vm1267_vm5 = vcmp.gt.f32.partialorder %v1053_v33, 0.0  ;;  %v1064_v53 = vadd.f32 %v1956_v38, %v2978_v15  ;;  %1981 = vmatprep.mubr.msk.bf16.mxu0 %vm1808_vm0, %v1809_v37  ;;  %v1299_v48 = vmul.f32 2.0, %v1053_v33 }
 0x22c   : > { %v1055_v60 = vpop.f32.mrf.mxu1  ;;  %1982 = vmatmul.mubr.msk.bf16.gmra.mxu0 %vm1811_vm7, %v1812_v36  ;;  %vm3102_vm8 = vmand %vm1251_vm6, %vm1267_vm5  ;;  %vm1258_vm5 = vcmp.eq.s32.totalorder %v1242_v7, 0 }
 0x22d   : > { %vm1270_vm3 = vcmp.gt.f32.partialorder %v1064_v53, 0.0  ;;  %v1056_v56 = vadd.f32 %v2978_v15, %v1055_v60  ;;  %v1302_v6 = vmul.f32 2.0, %v1064_v53 }
 0x22e   : > { %v1959_v50 = vpop.f32.mrf.mxu1  ;;  %vm3108_vm13 = vmand %vm3093_vm4, %vm1270_vm3  ;;  %vm1256_vm4 = vcmp.eq.s32.totalorder %v1240_v61, 0  ;;  %vm1257_vm3 = vcmp.eq.s32.totalorder %v1241_v22, 0 }
 0x22f   : > { %vm1268_vm14 = vcmp.gt.f32.partialorder %v1056_v56, 0.0  ;;  %v1300_v41 = vmul.f32 2.0, %v1056_v56  ;;  %v1818_v30 = vpack.c.bf16 %v1302_v6, %v1301_v42  ;;  %vm1817_vm0 = vmpackc.low %vm3108_vm13, %vm1285_vm10  ;;  %v1077_v55 = vadd.f32 %v1959_v50, %v2978_v15 }
 0x230   : > { %vm3112_vm15 = vmand %vm1252_vm9, %vm1268_vm14  ;;  %v1068_v14 = vpop.f32.mrf.mxu1 }
 0x231   : > { %v1815_v43 = vpack.c.bf16 %v1300_v41, %v1299_v48  ;;  %v1069_v52 = vadd.f32 %v2978_v15, %v1068_v14  ;;  %vm1814_vm1 = vmpackc.low %vm3112_vm15, %vm3102_vm8  ;;  %vm1273_vm11 = vcmp.gt.f32.partialorder %v1077_v55, 0.0  ;;  %v1305_v0 = vmul.f32 2.0, %v1077_v55 }
 0x232   : > { %v1960_v62 = vpop.f32.mrf.mxu1  ;;  %vm1289_vm15 = vmand %vm1257_vm3, %vm1273_vm11 }
 0x233   : > { %vm1271_vm6 = vcmp.gt.f32.partialorder %v1069_v52, 0.0  ;;  %v1080_v23 = vadd.f32 %v1960_v62, %v2978_v15  ;;  %1985 = vmatprep.mubr.msk.bf16.mxu1 %vm1814_vm1, %v1815_v43  ;;  %v1303_v57 = vmul.f32 2.0, %v1069_v52 }
 0x234   : > { %v1071_v1 = vpop.f32.mrf.mxu1  ;;  %1986 = vmatmul.mubr.msk.bf16.vlgmr.msra.gmra.mxu1 %vm1817_vm0, %v1818_v30  ;;  %vm1287_vm9 = vmand %vm1255_vm2, %vm1271_vm6 }
 0x235   : > { %vm1274_vm7 = vcmp.gt.f32.partialorder %v1080_v23, 0.0  ;;  %v1072_v58 = vadd.f32 %v2978_v15, %v1071_v1  ;;  %v1306_v59 = vmul.f32 2.0, %v1080_v23  ;;  %v3131_v15 = vld [vmem:[%s3225_s7] ss:$0 sm:$0xff] }
 0x236   : > { %vm1290_vm8 = vmand %vm1258_vm5, %vm1274_vm7 }
 0x237   : > { %vm1272_vm12 = vcmp.gt.f32.partialorder %v1072_v58, 0.0  ;;  %v1304_v3 = vmul.f32 2.0, %v1072_v58  ;;  %v1824_v49 = vpack.c.bf16 %v1306_v59, %v1305_v0  ;;  %vm1823_vm1 = vmpackc.low %vm1290_vm8, %vm1289_vm15 }
 0x238   : > { %vm1288_vm13 = vmand %vm1256_vm4, %vm1272_vm12 }
 0x239   : > { %v1821_v24 = vpack.c.bf16 %v1304_v3, %v1303_v57  ;;  %vm1820_vm14 = vmpackc.low %vm1288_vm13, %vm1287_vm9 }
 0x23b   : > { %1989 = vmatprep.mubr.msk.bf16.mxu1 %vm1820_vm14, %v1821_v24 }
 0x23c   : > { %1990 = vmatmul.mubr.msk.bf16.gmra.mxu1 %vm1823_vm1, %v1824_v49 }
 0x2e4   : > { %v1979_v27 = vpop.f32.mrf.mxu0 }
 0x2e5   : > { %v1445_v4 = vadd.f32 %v1979_v27, %v3131_v15 }
 0x2e6   : > { %v1436_v5 = vpop.f32.mrf.mxu0 }
 0x2e7   : > { %v1828_v8 = vmul.f32 -1.442695, %v1445_v4  ;;  %v1437_v12 = vadd.f32 %v3131_v15, %v1436_v5 }
 0x2e8   : > { %v1980_v16 = vpop.f32.mrf.mxu0 }
 0x2e9   : > { %2122 = vpow2.f32 %v1828_v8  ;;  %v1826_v17 = vmul.f32 -1.442695, %v1437_v12  ;;  %v1448_v10 = vadd.f32 %v1980_v16, %v3131_v15 }
 0x2ea   : > { %v1439_v34 = vpop.f32.mrf.mxu0 }
 0x2eb   : > { %2124 = vpow2.f32 %v1826_v17  ;;  %v1829_v28 = vmul.f32 -1.442695, %v1448_v10  ;;  %v1440_v21 = vadd.f32 %v3131_v15, %v1439_v34 }
 0x2ec   : > { %v1983_v29 = vpop.f32.mrf.mxu0 }
 0x2ed   : > { %2126 = vpow2.f32 %v1829_v28  ;;  %v1827_v19 = vmul.f32 -1.442695, %v1440_v21  ;;  %v1461_v18 = vadd.f32 %v1983_v29, %v3131_v15 }
 0x2ee   : > { %v1452_v31 = vpop.f32.mrf.mxu0 }
 0x2ef   : > { %2128 = vpow2.f32 %v1827_v19  ;;  %v1832_v20 = vmul.f32 -1.442695, %v1461_v18  ;;  %v1453_v13 = vadd.f32 %v3131_v15, %v1452_v31 }
 0x2f0   : > { %v1984_v32 = vpop.f32.mrf.mxu0 }
 0x2f1   : > { %2130 = vpow2.f32 %v1832_v20  ;;  %v1830_v37 = vmul.f32 -1.442695, %v1453_v13  ;;  %v1464_v33 = vadd.f32 %v1984_v32, %v3131_v15 }
 0x2f2   : > { %v1455_v35 = vpop.f32.mrf.mxu0 }
 0x2f3   : > { %2132 = vpow2.f32 %v1830_v37  ;;  %v1833_v39 = vmul.f32 -1.442695, %v1464_v33  ;;  %v1456_v36 = vadd.f32 %v3131_v15, %v1455_v35 }
 0x2f4   : > { %v1987_v25 = vpop.f32.mrf.mxu1 }
 0x2f5   : > { %2134 = vpow2.f32 %v1833_v39  ;;  %v1831_v38 = vmul.f32 -1.442695, %v1456_v36  ;;  %v1477_v40 = vadd.f32 %v1987_v25, %v3131_v15 }
 0x2f6   : > { %v2123_v47 = vpop.eup %2122  ;;  %v1468_v44 = vpop.f32.mrf.mxu1 }
 0x2f7   : > { %v1549_v53 = vadd.f32 1.0, %v2123_v47  ;;  %2136 = vpow2.f32 %v1831_v38  ;;  %v1836_v45 = vmul.f32 -1.442695, %v1477_v40  ;;  %v1469_v60 = vadd.f32 %v3131_v15, %v1468_v44 }
 0x2f8   : > { %v2125_v63 = vpop.eup %2124  ;;  %v1988_v56 = vpop.f32.mrf.mxu1 }
 0x2f9   : > { %2138 = vrcp.f32 %v1549_v53  ;;  %v1547_v46 = vadd.f32 1.0, %v2125_v63  ;;  %v1834_v51 = vmul.f32 -1.442695, %v1469_v60  ;;  %v1480_v54 = vadd.f32 %v1988_v56, %v3131_v15 }
 0x2fa   : > { %v2127_v6 = vpop.eup %2126  ;;  %2140 = vpow2.f32 %v1836_v45  ;;  %v1471_v50 = vpop.f32.mrf.mxu1 }
 0x2fb   : > { %2142 = vrcp.f32 %v1547_v46  ;;  %v1550_v11 = vadd.f32 1.0, %v2127_v6  ;;  %v1837_v9 = vmul.f32 -1.442695, %v1480_v54  ;;  %v1472_v48 = vadd.f32 %v3131_v15, %v1471_v50 }
 0x2fc   : > { %v2129_v2 = vpop.eup %2128  ;;  %2144 = vpow2.f32 %v1834_v51  ;;  %v1991_v41 = vpop.f32.mrf.mxu1 }
 0x2fd   : > { %2146 = vrcp.f32 %v1550_v11  ;;  %v1548_v42 = vadd.f32 1.0, %v2129_v2  ;;  %v1835_v26 = vmul.f32 -1.442695, %v1472_v48  ;;  %v1493_v14 = vadd.f32 %v1991_v41, %v3131_v15 }
 0x2fe   : > { %v2131_v7 = vpop.eup %2130  ;;  %2148 = vpow2.f32 %v1837_v9  ;;  %v1484_v43 = vpop.f32.mrf.mxu1 }
 0x2ff   : > { %2150 = vrcp.f32 %v1548_v42  ;;  %v1553_v52 = vadd.f32 1.0, %v2131_v7  ;;  %v1840_v61 = vmul.f32 -1.442695, %v1493_v14  ;;  %v1485_v30 = vadd.f32 %v3131_v15, %v1484_v43 }
 0x300   : > { %v2133_v22 = vpop.eup %2132  ;;  %2152 = vpow2.f32 %v1835_v26  ;;  %v1992_v62 = vpop.f32.mrf.mxu1 }
 0x301   : > { %2154 = vrcp.f32 %v1553_v52  ;;  %v1551_v55 = vadd.f32 1.0, %v2133_v22  ;;  %v1838_v23 = vmul.f32 -1.442695, %v1485_v30  ;;  %v1496_v1 = vadd.f32 %v1992_v62, %v3131_v15 }
 0x302   : > { %v2135_v58 = vpop.eup %2134  ;;  %2156 = vpow2.f32 %v1840_v61  ;;  %v1487_v59 = vpop.f32.mrf.mxu1 }
 0x303   : > { %2158 = vrcp.f32 %v1551_v55  ;;  %v1554_v57 = vadd.f32 1.0, %v2135_v58  ;;  %v1841_v3 = vmul.f32 -1.442695, %v1496_v1  ;;  %v1488_v0 = vadd.f32 %v3131_v15, %v1487_v59 }
 0x304   : > { %v2137_v24 = vpop.eup %2136  ;;  %2160 = vpow2.f32 %v1838_v23 }
 0x305   : > { %2162 = vrcp.f32 %v1554_v57  ;;  %v1552_v49 = vadd.f32 1.0, %v2137_v24  ;;  %v1839_v27 = vmul.f32 -1.442695, %v1488_v0 }
 0x306   : > { %v2139_v4 = vpop.eup %2138  ;;  %2164 = vpow2.f32 %v1841_v3 }
 0x307   : > { %v2141_v5 = vpop.eup %2140  ;;  %1597 = vst [vmem:[%s3150_s28 + $0x10] sm:$0xff] %v2139_v4  ;;  %2166 = vrcp.f32 %v1552_v49 }
 0x308   : > { %v2143_v8 = vpop.eup %2142  ;;  %v1557_v12 = vadd.f32 1.0, %v2141_v5  ;;  %2168 = vpow2.f32 %v1839_v27 }
 0x309   : > { %v2145_v15 = vpop.eup %2144  ;;  %1595 = vst [vmem:[%s3150_s28] sm:$0xff] %v2143_v8 }
 0x30a   : > { %v2147_v16 = vpop.eup %2146  ;;  %2170 = vrcp.f32 %v1557_v12  ;;  %v1555_v17 = vadd.f32 1.0, %v2145_v15 }
 0x30b   : > { %v2149_v10 = vpop.eup %2148  ;;  %1598 = vst [vmem:[%s3150_s28 + $0x18] sm:$0xff] %v2147_v16 }
 0x30c   : > { %v2151_v34 = vpop.eup %2150  ;;  %2172 = vrcp.f32 %v1555_v17  ;;  %v1558_v28 = vadd.f32 1.0, %v2149_v10 }
 0x30d   : > { %v2153_v21 = vpop.eup %2152  ;;  %1596 = vst [vmem:[%s3150_s28 + $0x8] sm:$0xff] %v2151_v34 }
 0x30e   : > { %v2155_v29 = vpop.eup %2154  ;;  %2174 = vrcp.f32 %v1558_v28  ;;  %v1556_v19 = vadd.f32 1.0, %v2153_v21 }
 0x30f   : > { %v2157_v18 = vpop.eup %2156  ;;  %1601 = vst [vmem:[%s3150_s28 + $0x30] sm:$0xff] %v2155_v29 }
 0x310   : > { %v2159_v31 = vpop.eup %2158  ;;  %2176 = vrcp.f32 %v1556_v19  ;;  %v1561_v20 = vadd.f32 1.0, %v2157_v18 }
 0x311   : > { %v2161_v13 = vpop.eup %2160  ;;  %1599 = vst [vmem:[%s3150_s28 + $0x20] sm:$0xff] %v2159_v31 }
 0x312   : > { %v2163_v32 = vpop.eup %2162  ;;  %2178 = vrcp.f32 %v1561_v20  ;;  %v1559_v37 = vadd.f32 1.0, %v2161_v13 }
 0x313   : > { %v2165_v33 = vpop.eup %2164  ;;  %1602 = vst [vmem:[%s3150_s28 + $0x38] sm:$0xff] %v2163_v32 }
 0x314   : > { %v2167_v35 = vpop.eup %2166  ;;  %2180 = vrcp.f32 %v1559_v37  ;;  %v1562_v39 = vadd.f32 1.0, %v2165_v33 }
 0x315   : > { %v2169_v36 = vpop.eup %2168  ;;  %1600 = vst [vmem:[%s3150_s28 + $0x28] sm:$0xff] %v2167_v35 }
 0x316   : > { %2182 = vrcp.f32 %v1562_v39  ;;  %v1560_v25 = vadd.f32 1.0, %v2169_v36 }
 0x317   : > { %v2171_v38 = vpop.eup %2170 }
 0x318   : > { %1605 = vst [vmem:[%s3150_s28 + $0x50] sm:$0xff] %v2171_v38  ;;  %2184 = vrcp.f32 %v1560_v25 }
 0x319   : > { %v2173_v40 = vpop.eup %2172 }
 0x31a   : > { %1603 = vst [vmem:[%s3150_s28 + $0x40] sm:$0xff] %v2173_v40 }
 0x31b   : > { %v2175_v47 = vpop.eup %2174 }
 0x31c   : > { %1606 = vst [vmem:[%s3150_s28 + $0x58] sm:$0xff] %v2175_v47 }
 0x31d   : > { %v2177_v44 = vpop.eup %2176 }
 0x31e   : > { %1604 = vst [vmem:[%s3150_s28 + $0x48] sm:$0xff] %v2177_v44 }
 0x31f   : > { %v2179_v53 = vpop.eup %2178 }
 0x320   : > { %1609 = vst [vmem:[%s3150_s28 + $0x70] sm:$0xff] %v2179_v53 }
 0x321   : > { %v2181_v45 = vpop.eup %2180 }
 0x322   : > { %1607 = vst [vmem:[%s3150_s28 + $0x60] sm:$0xff] %v2181_v45 }
 0x323   : > { %v2183_v60 = vpop.eup %2182 }
 0x324   : > { %1610 = vst [vmem:[%s3150_s28 + $0x78] sm:$0xff] %v2183_v60 }
 0x325   : > { %v2185_v63 = vpop.eup %2184 }
 0x326   : > { %1608 = vst [vmem:[%s3150_s28 + $0x68] sm:$0xff] %v2185_v63 }
 0x327   : > { %2305 = shalt.err (!%p2302_p10)
}
 0x328   : > { %s2306_s16 = scalar_lea.hbm %s3171_s14, 2048  ;;  %s2310_s23 = scalar_lea.hbm %s3226_s8, 4096 }
 0x329   : > { %p2307_p6 = scmp.ne.s32.totalorder %s3171_s14, %s2306_s16  ;;  %p2311_p3 = scmp.lt.s32.totalorder %s3171_s14, %s3226_s8 }
 0x32a   : > { %p2312_p11 = scmp.lt.s32.totalorder %s2310_s23, %s2306_s16 }
 0x32b   : > { %p2308_p4 = pnand %p2307_p6, %p3331_p1 }
 0x32c   : > { %p2313_p5 = por %p2312_p11, %p2311_p3 }
 0x32d   : > { %p2309_p8 = pneg %p2308_p4 }
 0x32f   : > { %p2314_p7 = pnand %p2313_p5, %p2309_p8 }
 0x331   : > { %2317 = shalt.err (!%p2314_p7)
}
 0x332   : > { %s2373_s11 = smov 128   ;;  %s2374_s12 = smov 8  }
 0x333   : > { %2023 = dma.vmem_to_hbm [thread:$0]  (%p3331_p1), %s3173_s21, 2048, %s3171_s14, %s1612_s15, %s2373_s11, %s2373_s11, %s2374_s12  }
 0x334 PF: > { %s1640_s18 = sand.u32 1, %s2352_s29   ;;  %p3332_p12 = scmp.ne.s32.totalorder %s3235_s13, 0 }
 0x335   : > { %p3333_p9 = scmp.ge.s32.totalorder %s2364_s10, 2  ;;  %s1641_s0 = scalar_lea.sflag [#allocation6], %s1640_s18 }
 0x337   : > { %p2040_p13 = pnand %p3333_p9, %p3332_p12 }
 0x339   : > { %p2041_p0 = pneg %p2040_p13 }
 0x33b   : > { %2347 = dma.done.wait (%p2041_p0), %s1641_s0, 2048  }
 0x33c   : > { %2349 = vsyncadd (%p2041_p0), %s1641_s0, 4294965248  ;;  %p24_p2 = scmp.ge.s32.totalorder %s2512_s19, 4   ;;  %s3334_s29 = smov %s2356_s30 }
 0x33d   : > { %s3335_s30 = smov %s2360_s9  ;;  %s3336_s9 = smov %s2522_s22 }
 0x33e   : > { %s3337_s10 = smov %s2512_s19  ;;  %26 = sbr.rel (!%p24_p2) target bundleno = 10 (0xa), region = 105 }
 0x343   :  { %1646 = vsyncpa [#allocation5], 1 }
 0x344   :  { %1648 = vsyncpa [#allocation5 + $0x1], 1 }
 0x345   :  { %1649 = vsyncpa [#allocation8], 1 }
 0x346   :  { %1650 = vsyncpa [#allocation11], 1 }
 0x347   :  { %1651 = vsyncpa [#allocation6], 1 }
 0x348   :  { %1653 = vsyncpa [#allocation6 + $0x1], 1 }

</bundles_post_ra>
